<compile_context>
chip_gen: v7x
topology: tpu7x:2x2x1
jax: 0.10.0
libtpu: 0.0.40
codegen_flags: <defaults>
</compile_context>

<pallas_src>
import functools
import math

import jax
import jax.numpy as jnp
from jax import lax
from jax.experimental import pallas as pl
from jax.experimental.pallas import tpu as pltpu


def _round_up(x, m):
    return ((x + m - 1) // m) * m


# ----------------------------------------------------------------------------
# Pallas kernel: shift-and-matmul conv tile + bias + optional ReLU
# ----------------------------------------------------------------------------
def _conv_shift_mm_kernel(x_ref, w_ref, b_ref, o_ref, acc_ref, *,
                          KH, KW, Wp, TOH, TM, stride, n_oh_tiles, apply_relu):
    """Computes one output tile of TM = TOH*Wp "wide" rows x TOC channels.

    x_ref  : (1, Hp_eff*Wp, C)  flattened, padded NHWC image (bf16), resident
    w_ref  : (KH, KW, C, TOC)   weight tile (bf16)
    b_ref  : (1, TOC)           bias tile (f32)
    o_ref  : (1, TM, TOC)       output tile
    acc_ref: (TM, TOC) f32      VMEM accumulator scratch
    """
    if n_oh_tiles == 1:
        row_flat0 = 0                              # static slice offsets
    else:
        t = pl.program_id(2)
        row_flat0 = pl.multiple_of(t * (TOH * stride * Wp), 8)

    acc_ref[...] = jnp.zeros_like(acc_ref)

    for i in range(KH):
        for j in range(KW):
            start = row_flat0 + i * Wp + j
            if stride == 1:
                win = x_ref[0, pl.ds(start, TM), :]            # (TM, C)
            else:
                win = x_ref[0, pl.ds(start, TM, stride), :]    # strided taps
            acc_ref[...] += jnp.dot(win, w_ref[i, j],
                                    preferred_element_type=jnp.float32)

    res = acc_ref[...] + b_ref[...]                # f32 epilogue
    if apply_relu:
        res = jnp.maximum(res, 0.0)
    o_ref[0] = res.astype(o_ref.dtype)


# ----------------------------------------------------------------------------
# Host-side wrapper: layout, padding, tile planning, pallas_call
# ----------------------------------------------------------------------------
def conv2d_bias_act_pallas(x_nhwc, w_hwio, bias, *, stride=1, padding=0,
                           apply_relu=True, compute_dtype=jnp.bfloat16,
                           out_dtype=None):
    """Fused Conv2d + bias (+ ReLU).  x_nhwc: [N,H,W,C], w_hwio: [KH,KW,C,OC]."""
    N, H, W, C = x_nhwc.shape
    KH, KW, _, OC = w_hwio.shape
    s = int(stride)
    Hp = H + 2 * padding
    Wp = W + 2 * padding
    OH = (Hp - KH) // s + 1
    OW = (Wp - KW) // s + 1
    if out_dtype is None:
        out_dtype = x_nhwc.dtype

    cd_bytes = jnp.dtype(compute_dtype).itemsize
    od_bytes = jnp.dtype(out_dtype).itemsize

    # ---- tile plan ---------------------------------------------------------
    OC_pad = _round_up(OC, 128)                    # lane-dense output stores
    TOC = 256 if OC_pad % 256 == 0 else 128        # 256-multiples on v6e/v7x

    def vmem_bytes(toh):
        oh_pad = _round_up(OH, toh)
        hp_eff = oh_pad * s + KH
        tm = toh * Wp
        return (2 * hp_eff * Wp * C * cd_bytes       # image (double-buffered)
                + 2 * KH * KW * C * TOC * cd_bytes   # weight tile
                + 2 * TOC * 4                        # bias tile
                + 2 * tm * TOC * od_bytes            # output tile
                + tm * TOC * 4)                      # f32 accumulator

    budget = 24 * 1024 * 1024                        # headroom vs v7x 32 MiB scoped
    OH8 = _round_up(OH, 8)
    if vmem_bytes(OH8) <= budget:
        TOH = OH8                                    # single OH tile -> static slices
    else:
        TOH = max(8, ((512 // max(Wp, 1)) // 8) * 8)  # target ~512 matmul rows
        TOH = min(TOH, OH8)
        while TOH > 8 and vmem_bytes(TOH) > budget:
            TOH -= 8
    OH_pad = _round_up(OH, TOH)
    Hp_eff = OH_pad * s + KH                         # covers the flat-slice overrun
    TM = TOH * Wp
    n_oc = OC_pad // TOC
    n_t = OH_pad // TOH

    vmem_kwargs = {}
    est = vmem_bytes(TOH)
    if est > budget:
        # TODO(synk): very large feature maps need an H-tiled manual-DMA (halo)
        # pipeline; here we only raise the scoped VMEM limit as a fallback.
        vmem_kwargs["vmem_limit_bytes"] = int(min(est * 3 // 2, 96 * 1024 * 1024))

    # ---- layout / padding (cheap: no KH*KW im2col expansion) ---------------
    xb = x_nhwc.astype(compute_dtype)
    pad_bottom = Hp_eff - H - padding
    xp = jnp.pad(xb, ((0, 0), (padding, pad_bottom), (padding, padding), (0, 0)))
    x2d = xp.reshape(N, Hp_eff * Wp, C)

    wb = w_hwio.astype(compute_dtype)
    if OC_pad != OC:
        wb = jnp.pad(wb, ((0, 0), (0, 0), (0, 0), (0, OC_pad - OC)))
    b2d = jnp.pad(bias.astype(jnp.float32), (0, OC_pad - OC)).reshape(1, OC_pad)

    kernel = functools.partial(
        _conv_shift_mm_kernel, KH=KH, KW=KW, Wp=Wp, TOH=TOH, TM=TM,
        stride=s, n_oh_tiles=n_t, apply_relu=apply_relu)

    flops = 2 * N * OH_pad * Wp * KH * KW * C * OC_pad
    bytes_accessed = (N * Hp_eff * Wp * C * cd_bytes
                      + KH * KW * C * OC_pad * cd_bytes
                      + OC_pad * 4
                      + N * OH_pad * Wp * OC_pad * od_bytes)

    out_flat = pl.pallas_call(
        kernel,
        out_shape=jax.ShapeDtypeStruct((N, OH_pad * Wp, OC_pad), out_dtype),
        grid_spec=pltpu.PrefetchScalarGridSpec(
            num_scalar_prefetch=0,
            grid=(N, n_oc, n_t),
            in_specs=[
                # Whole padded image for batch n: constant over the inner axes
                # -> DMA'd once per n, stays VMEM-resident (~1x HBM read).
                pl.BlockSpec((1, Hp_eff * Wp, C), lambda n, jc, t: (n, 0, 0)),
                # Weight tile: constant over the innermost (OH-tile) axis.
                pl.BlockSpec((KH, KW, C, TOC), lambda n, jc, t: (0, 0, 0, jc)),
                pl.BlockSpec((1, TOC), lambda n, jc, t: (0, jc)),
            ],
            out_specs=pl.BlockSpec((1, TM, TOC), lambda n, jc, t: (n, t, jc)),
            scratch_shapes=[pltpu.VMEM((TM, TOC), jnp.float32)],
        ),
        compiler_params=pltpu.CompilerParams(
            dimension_semantics=("parallel", "parallel", "parallel"),
            **vmem_kwargs),
        cost_estimate=pl.CostEstimate(
            flops=flops, transcendentals=0, bytes_accessed=bytes_accessed),
    )(x2d, wb, b2d)

    out = out_flat.reshape(N, OH_pad, Wp, OC_pad)[:, :OH, :OW, :OC]
    return out


# ----------------------------------------------------------------------------
# Module mirroring SAMCNN.Conv2d (conv + optional eval-mode BN + optional ReLU)
# ----------------------------------------------------------------------------
class Conv2dPallas:

    def __init__(self, in_channels, out_channels, kernel_size, stride=1,
                 relu=True, same_padding=False, bn=False, *, key,
                 compute_dtype=jnp.bfloat16):
        self.in_channels = in_channels
        self.out_channels = out_channels
        self.kernel_size = kernel_size
        self.stride = stride
        self.relu = relu
        self.padding = int((kernel_size - 1) / 2) if same_padding else 0
        self.bn = bn
        self.compute_dtype = compute_dtype

        k_w, k_b = jax.random.split(key)
        fan_in = in_channels * kernel_size * kernel_size
        bound = 1.0 / math.sqrt(fan_in)
        # PyTorch OIHW layout for parity with the reference module.
        self.weight = jax.random.uniform(
            k_w, (out_channels, in_channels, kernel_size, kernel_size),
            minval=-bound, maxval=bound, dtype=jnp.float32)
        self.bias = jax.random.uniform(
            k_b, (out_channels,), minval=-bound, maxval=bound, dtype=jnp.float32)

        if bn:
            # Eval-mode BatchNorm2d(eps=1e-3) folds into a per-channel affine.
            # TODO(synk): training-mode BatchNorm (batch statistics) not implemented.
            self.bn_gamma = jnp.ones((out_channels,), jnp.float32)
            self.bn_beta = jnp.zeros((out_channels,), jnp.float32)
            self.bn_mean = jnp.zeros((out_channels,), jnp.float32)
            self.bn_var = jnp.ones((out_channels,), jnp.float32)
            self.bn_eps = 1e-3

    def _folded_params(self):
        w_hwio = jnp.transpose(self.weight, (2, 3, 1, 0))     # OIHW -> HWIO
        b = self.bias
        if self.bn:
            scale = self.bn_gamma / jnp.sqrt(self.bn_var + self.bn_eps)
            w_hwio = w_hwio * scale[None, None, None, :]
            b = (b - self.bn_mean) * scale + self.bn_beta
        return w_hwio, b

    def __call__(self, x, *, data_format="NCHW"):
        """x: [N,C,H,W] (default) or [N,H,W,C] with data_format='NHWC'.

        When chaining Conv2dPallas layers pass data_format='NHWC' to avoid two
        full-tensor transposes per layer (internal compute is NHWC).
        """
        x_nhwc = jnp.transpose(x, (0, 2, 3, 1)) if data_format == "NCHW" else x
        w_hwio, b = self._folded_params()
        y = conv2d_bias_act_pallas(
            x_nhwc, w_hwio, b, stride=self.stride, padding=self.padding,
            apply_relu=self.relu, compute_dtype=self.compute_dtype,
            out_dtype=x.dtype)
        if data_format == "NCHW":
            y = jnp.transpose(y, (0, 3, 1, 2))
        return y


# ----------------------------------------------------------------------------
# Main: build, run, validate against lax.conv reference, print KERNEL_OK
# ----------------------------------------------------------------------------
if __name__ == "__main__":
    key = jax.random.PRNGKey(0)
    k_x, k_m = jax.random.split(key)

    N, C, H, W = 2, 4, 16, 16
    OC, KS = 8, 3

    x = jax.random.normal(k_x, (N, C, H, W), dtype=jnp.float32)
    mod = Conv2dPallas(C, OC, KS, stride=1, relu=True,
                       same_padding=True, bn=False, key=k_m)

    y = jax.block_until_ready(mod(x))

    # Reference: identical math on bf16-rounded inputs (the kernel computes
    # bf16 x bf16 products with f32 accumulation), plus bias and ReLU.
    xq = x.astype(jnp.bfloat16).astype(jnp.float32)
    wq = mod.weight.astype(jnp.bfloat16).astype(jnp.float32)
    ref = lax.conv_general_dilated(
        xq, wq, window_strides=(1, 1),
        padding=[(mod.padding, mod.padding)] * 2,
        dimension_numbers=("NCHW", "OIHW", "NCHW"),
        precision=lax.Precision.HIGHEST)
    ref = ref + mod.bias.reshape(1, OC, 1, 1)
    ref = jnp.maximum(ref, 0.0)

    assert y.shape == (N, OC, H, W), y.shape
    err = float(jnp.max(jnp.abs(y - ref)))
    assert jnp.allclose(y, ref, atol=1e-2, rtol=1e-2), err

    print("KERNEL_OK")
</pallas_src>

<mosaic_0001>
module attributes {stable_mosaic.version = 11 : i64} {
  func.func @_conv_shift_mm_kernel(%arg0: i32, %arg1: i32, %arg2: i32, %arg3: memref<1x342x4xbf16, #tpu.memory_space<vmem>>, %arg4: memref<3x3x4x128xbf16, #tpu.memory_space<vmem>>, %arg5: memref<1x128xf32, #tpu.memory_space<vmem>>, %arg6: memref<1x288x128xf32, #tpu.memory_space<vmem>>, %arg7: memref<288x128xf32, #tpu.memory_space<vmem>>) attributes {dimension_semantics = [#tpu.dimension_semantics<parallel>, #tpu.dimension_semantics<parallel>, #tpu.dimension_semantics<parallel>], iteration_bounds = array<i64: 2, 1, 1>, scalar_prefetch = 0 : i64, scratch_operands = 1 : i64, tpu.core_type = #tpu.core_type<tc>, window_params = [{transform_indices = @transform_0, window_bounds = array<i64: 1, 342, 4>}, {transform_indices = @transform_1, window_bounds = array<i64: 3, 3, 4, 128>}, {transform_indices = @transform_2, window_bounds = array<i64: 1, 128>}, {transform_indices = @transform_3, window_bounds = array<i64: 1, 288, 128>}]} {
    %cst = arith.constant 0.000000e+00 : f32
    %0 = vector.broadcast %cst : f32 to vector<288x128xf32>
    %c0 = arith.constant 0 : index
    %c0_0 = arith.constant 0 : index
    %1 = vector.load %arg7[%c0, %c0_0] : memref<288x128xf32, #tpu.memory_space<vmem>>, vector<288x128xf32>
    tpu.vector_store %arg7[%c0, %c0_0], %0 {strides = array<i32>} : memref<288x128xf32, #tpu.memory_space<vmem>>, vector<288x128xf32>,
    %c0_1 = arith.constant 0 : index
    %c0_2 = arith.constant 0 : index
    %c0_3 = arith.constant 0 : index
    %2 = vector.load %arg3[%c0_1, %c0_2, %c0_3] : memref<1x342x4xbf16, #tpu.memory_space<vmem>>, vector<1x288x4xbf16>
    %3 = vector.shape_cast %2 : vector<1x288x4xbf16> to vector<288x4xbf16>
    %c0_4 = arith.constant 0 : index
    %c0_5 = arith.constant 0 : index
    %4 = vector.load %arg7[%c0_4, %c0_5] : memref<288x128xf32, #tpu.memory_space<vmem>>, vector<288x128xf32>
    %c0_6 = arith.constant 0 : index
    %c0_7 = arith.constant 0 : index
    %c0_8 = arith.constant 0 : index
    %c0_9 = arith.constant 0 : index
    %5 = vector.load %arg4[%c0_6, %c0_7, %c0_8, %c0_9] : memref<3x3x4x128xbf16, #tpu.memory_space<vmem>>, vector<1x1x4x128xbf16>
    %6 = vector.shape_cast %5 : vector<1x1x4x128xbf16> to vector<4x128xbf16>
    %cst_10 = arith.constant dense<0.000000e+00> : vector<288x128xf32>
    %7 = tpu.matmul %3, %6, %cst_10 {dimension_numbers = #tpu.dot_dimension_numbers<[1], [0], [0], [1], [0, 0, 1, 1], [], []>} : vector<288x4xbf16>, vector<4x128xbf16>, vector<288x128xf32> -> vector<288x128xf32>
    %8 = arith.addf %4, %7 : vector<288x128xf32>
    %c0_11 = arith.constant 0 : index
    %c0_12 = arith.constant 0 : index
    %9 = vector.load %arg7[%c0_11, %c0_12] : memref<288x128xf32, #tpu.memory_space<vmem>>, vector<288x128xf32>
    tpu.vector_store %arg7[%c0_11, %c0_12], %8 {strides = array<i32>} : memref<288x128xf32, #tpu.memory_space<vmem>>, vector<288x128xf32>,
    %c0_13 = arith.constant 0 : index
    %c1 = arith.constant 1 : index
    %c0_14 = arith.constant 0 : index
    %10 = vector.load %arg3[%c0_13, %c1, %c0_14] : memref<1x342x4xbf16, #tpu.memory_space<vmem>>, vector<1x288x4xbf16>
    %11 = vector.shape_cast %10 : vector<1x288x4xbf16> to vector<288x4xbf16>
    %c0_15 = arith.constant 0 : index
    %c0_16 = arith.constant 0 : index
    %12 = vector.load %arg7[%c0_15, %c0_16] : memref<288x128xf32, #tpu.memory_space<vmem>>, vector<288x128xf32>
    %c0_17 = arith.constant 0 : index
    %c1_18 = arith.constant 1 : index
    %c0_19 = arith.constant 0 : index
    %c0_20 = arith.constant 0 : index
    %13 = vector.load %arg4[%c0_17, %c1_18, %c0_19, %c0_20] : memref<3x3x4x128xbf16, #tpu.memory_space<vmem>>, vector<1x1x4x128xbf16>
    %14 = vector.shape_cast %13 : vector<1x1x4x128xbf16> to vector<4x128xbf16>
    %cst_21 = arith.constant dense<0.000000e+00> : vector<288x128xf32>
    %15 = tpu.matmul %11, %14, %cst_21 {dimension_numbers = #tpu.dot_dimension_numbers<[1], [0], [0], [1], [0, 0, 1, 1], [], []>} : vector<288x4xbf16>, vector<4x128xbf16>, vector<288x128xf32> -> vector<288x128xf32>
    %16 = arith.addf %12, %15 : vector<288x128xf32>
    %c0_22 = arith.constant 0 : index
    %c0_23 = arith.constant 0 : index
    %17 = vector.load %arg7[%c0_22, %c0_23] : memref<288x128xf32, #tpu.memory_space<vmem>>, vector<288x128xf32>
    tpu.vector_store %arg7[%c0_22, %c0_23], %16 {strides = array<i32>} : memref<288x128xf32, #tpu.memory_space<vmem>>, vector<288x128xf32>,
    %c0_24 = arith.constant 0 : index
    %c2 = arith.constant 2 : index
    %c0_25 = arith.constant 0 : index
    %18 = vector.load %arg3[%c0_24, %c2, %c0_25] : memref<1x342x4xbf16, #tpu.memory_space<vmem>>, vector<1x288x4xbf16>
    %19 = vector.shape_cast %18 : vector<1x288x4xbf16> to vector<288x4xbf16>
    %c0_26 = arith.constant 0 : index
    %c0_27 = arith.constant 0 : index
    %20 = vector.load %arg7[%c0_26, %c0_27] : memref<288x128xf32, #tpu.memory_space<vmem>>, vector<288x128xf32>
    %c0_28 = arith.constant 0 : index
    %c2_29 = arith.constant 2 : index
    %c0_30 = arith.constant 0 : index
    %c0_31 = arith.constant 0 : index
    %21 = vector.load %arg4[%c0_28, %c2_29, %c0_30, %c0_31] : memref<3x3x4x128xbf16, #tpu.memory_space<vmem>>, vector<1x1x4x128xbf16>
    %22 = vector.shape_cast %21 : vector<1x1x4x128xbf16> to vector<4x128xbf16>
    %cst_32 = arith.constant dense<0.000000e+00> : vector<288x128xf32>
    %23 = tpu.matmul %19, %22, %cst_32 {dimension_numbers = #tpu.dot_dimension_numbers<[1], [0], [0], [1], [0, 0, 1, 1], [], []>} : vector<288x4xbf16>, vector<4x128xbf16>, vector<288x128xf32> -> vector<288x128xf32>
    %24 = arith.addf %20, %23 : vector<288x128xf32>
    %c0_33 = arith.constant 0 : index
    %c0_34 = arith.constant 0 : index
    %25 = vector.load %arg7[%c0_33, %c0_34] : memref<288x128xf32, #tpu.memory_space<vmem>>, vector<288x128xf32>
    tpu.vector_store %arg7[%c0_33, %c0_34], %24 {strides = array<i32>} : memref<288x128xf32, #tpu.memory_space<vmem>>, vector<288x128xf32>,
    %c0_35 = arith.constant 0 : index
    %c18 = arith.constant 18 : index
    %c0_36 = arith.constant 0 : index
    %26 = vector.load %arg3[%c0_35, %c18, %c0_36] : memref<1x342x4xbf16, #tpu.memory_space<vmem>>, vector<1x288x4xbf16>
    %27 = vector.shape_cast %26 : vector<1x288x4xbf16> to vector<288x4xbf16>
    %c0_37 = arith.constant 0 : index
    %c0_38 = arith.constant 0 : index
    %28 = vector.load %arg7[%c0_37, %c0_38] : memref<288x128xf32, #tpu.memory_space<vmem>>, vector<288x128xf32>
    %c1_39 = arith.constant 1 : index
    %c0_40 = arith.constant 0 : index
    %c0_41 = arith.constant 0 : index
    %c0_42 = arith.constant 0 : index
    %29 = vector.load %arg4[%c1_39, %c0_40, %c0_41, %c0_42] : memref<3x3x4x128xbf16, #tpu.memory_space<vmem>>, vector<1x1x4x128xbf16>
    %30 = vector.shape_cast %29 : vector<1x1x4x128xbf16> to vector<4x128xbf16>
    %cst_43 = arith.constant dense<0.000000e+00> : vector<288x128xf32>
    %31 = tpu.matmul %27, %30, %cst_43 {dimension_numbers = #tpu.dot_dimension_numbers<[1], [0], [0], [1], [0, 0, 1, 1], [], []>} : vector<288x4xbf16>, vector<4x128xbf16>, vector<288x128xf32> -> vector<288x128xf32>
    %32 = arith.addf %28, %31 : vector<288x128xf32>
    %c0_44 = arith.constant 0 : index
    %c0_45 = arith.constant 0 : index
    %33 = vector.load %arg7[%c0_44, %c0_45] : memref<288x128xf32, #tpu.memory_space<vmem>>, vector<288x128xf32>
    tpu.vector_store %arg7[%c0_44, %c0_45], %32 {strides = array<i32>} : memref<288x128xf32, #tpu.memory_space<vmem>>, vector<288x128xf32>,
    %c0_46 = arith.constant 0 : index
    %c19 = arith.constant 19 : index
    %c0_47 = arith.constant 0 : index
    %34 = vector.load %arg3[%c0_46, %c19, %c0_47] : memref<1x342x4xbf16, #tpu.memory_space<vmem>>, vector<1x288x4xbf16>
    %35 = vector.shape_cast %34 : vector<1x288x4xbf16> to vector<288x4xbf16>
    %c0_48 = arith.constant 0 : index
    %c0_49 = arith.constant 0 : index
    %36 = vector.load %arg7[%c0_48, %c0_49] : memref<288x128xf32, #tpu.memory_space<vmem>>, vector<288x128xf32>
    %c1_50 = arith.constant 1 : index
    %c1_51 = arith.constant 1 : index
    %c0_52 = arith.constant 0 : index
    %c0_53 = arith.constant 0 : index
    %37 = vector.load %arg4[%c1_50, %c1_51, %c0_52, %c0_53] : memref<3x3x4x128xbf16, #tpu.memory_space<vmem>>, vector<1x1x4x128xbf16>
    %38 = vector.shape_cast %37 : vector<1x1x4x128xbf16> to vector<4x128xbf16>
    %cst_54 = arith.constant dense<0.000000e+00> : vector<288x128xf32>
    %39 = tpu.matmul %35, %38, %cst_54 {dimension_numbers = #tpu.dot_dimension_numbers<[1], [0], [0], [1], [0, 0, 1, 1], [], []>} : vector<288x4xbf16>, vector<4x128xbf16>, vector<288x128xf32> -> vector<288x128xf32>
    %40 = arith.addf %36, %39 : vector<288x128xf32>
    %c0_55 = arith.constant 0 : index
    %c0_56 = arith.constant 0 : index
    %41 = vector.load %arg7[%c0_55, %c0_56] : memref<288x128xf32, #tpu.memory_space<vmem>>, vector<288x128xf32>
    tpu.vector_store %arg7[%c0_55, %c0_56], %40 {strides = array<i32>} : memref<288x128xf32, #tpu.memory_space<vmem>>, vector<288x128xf32>,
    %c0_57 = arith.constant 0 : index
    %c20 = arith.constant 20 : index
    %c0_58 = arith.constant 0 : index
    %42 = vector.load %arg3[%c0_57, %c20, %c0_58] : memref<1x342x4xbf16, #tpu.memory_space<vmem>>, vector<1x288x4xbf16>
    %43 = vector.shape_cast %42 : vector<1x288x4xbf16> to vector<288x4xbf16>
    %c0_59 = arith.constant 0 : index
    %c0_60 = arith.constant 0 : index
    %44 = vector.load %arg7[%c0_59, %c0_60] : memref<288x128xf32, #tpu.memory_space<vmem>>, vector<288x128xf32>
    %c1_61 = arith.constant 1 : index
    %c2_62 = arith.constant 2 : index
    %c0_63 = arith.constant 0 : index
    %c0_64 = arith.constant 0 : index
    %45 = vector.load %arg4[%c1_61, %c2_62, %c0_63, %c0_64] : memref<3x3x4x128xbf16, #tpu.memory_space<vmem>>, vector<1x1x4x128xbf16>
    %46 = vector.shape_cast %45 : vector<1x1x4x128xbf16> to vector<4x128xbf16>
    %cst_65 = arith.constant dense<0.000000e+00> : vector<288x128xf32>
    %47 = tpu.matmul %43, %46, %cst_65 {dimension_numbers = #tpu.dot_dimension_numbers<[1], [0], [0], [1], [0, 0, 1, 1], [], []>} : vector<288x4xbf16>, vector<4x128xbf16>, vector<288x128xf32> -> vector<288x128xf32>
    %48 = arith.addf %44, %47 : vector<288x128xf32>
    %c0_66 = arith.constant 0 : index
    %c0_67 = arith.constant 0 : index
    %49 = vector.load %arg7[%c0_66, %c0_67] : memref<288x128xf32, #tpu.memory_space<vmem>>, vector<288x128xf32>
    tpu.vector_store %arg7[%c0_66, %c0_67], %48 {strides = array<i32>} : memref<288x128xf32, #tpu.memory_space<vmem>>, vector<288x128xf32>,
    %c0_68 = arith.constant 0 : index
    %c36 = arith.constant 36 : index
    %c0_69 = arith.constant 0 : index
    %50 = vector.load %arg3[%c0_68, %c36, %c0_69] : memref<1x342x4xbf16, #tpu.memory_space<vmem>>, vector<1x288x4xbf16>
    %51 = vector.shape_cast %50 : vector<1x288x4xbf16> to vector<288x4xbf16>
    %c0_70 = arith.constant 0 : index
    %c0_71 = arith.constant 0 : index
    %52 = vector.load %arg7[%c0_70, %c0_71] : memref<288x128xf32, #tpu.memory_space<vmem>>, vector<288x128xf32>
    %c2_72 = arith.constant 2 : index
    %c0_73 = arith.constant 0 : index
    %c0_74 = arith.constant 0 : index
    %c0_75 = arith.constant 0 : index
    %53 = vector.load %arg4[%c2_72, %c0_73, %c0_74, %c0_75] : memref<3x3x4x128xbf16, #tpu.memory_space<vmem>>, vector<1x1x4x128xbf16>
    %54 = vector.shape_cast %53 : vector<1x1x4x128xbf16> to vector<4x128xbf16>
    %cst_76 = arith.constant dense<0.000000e+00> : vector<288x128xf32>
    %55 = tpu.matmul %51, %54, %cst_76 {dimension_numbers = #tpu.dot_dimension_numbers<[1], [0], [0], [1], [0, 0, 1, 1], [], []>} : vector<288x4xbf16>, vector<4x128xbf16>, vector<288x128xf32> -> vector<288x128xf32>
    %56 = arith.addf %52, %55 : vector<288x128xf32>
    %c0_77 = arith.constant 0 : index
    %c0_78 = arith.constant 0 : index
    %57 = vector.load %arg7[%c0_77, %c0_78] : memref<288x128xf32, #tpu.memory_space<vmem>>, vector<288x128xf32>
    tpu.vector_store %arg7[%c0_77, %c0_78], %56 {strides = array<i32>} : memref<288x128xf32, #tpu.memory_space<vmem>>, vector<288x128xf32>,
    %c0_79 = arith.constant 0 : index
    %c37 = arith.constant 37 : index
    %c0_80 = arith.constant 0 : index
    %58 = vector.load %arg3[%c0_79, %c37, %c0_80] : memref<1x342x4xbf16, #tpu.memory_space<vmem>>, vector<1x288x4xbf16>
    %59 = vector.shape_cast %58 : vector<1x288x4xbf16> to vector<288x4xbf16>
    %c0_81 = arith.constant 0 : index
    %c0_82 = arith.constant 0 : index
    %60 = vector.load %arg7[%c0_81, %c0_82] : memref<288x128xf32, #tpu.memory_space<vmem>>, vector<288x128xf32>
    %c2_83 = arith.constant 2 : index
    %c1_84 = arith.constant 1 : index
    %c0_85 = arith.constant 0 : index
    %c0_86 = arith.constant 0 : index
    %61 = vector.load %arg4[%c2_83, %c1_84, %c0_85, %c0_86] : memref<3x3x4x128xbf16, #tpu.memory_space<vmem>>, vector<1x1x4x128xbf16>
    %62 = vector.shape_cast %61 : vector<1x1x4x128xbf16> to vector<4x128xbf16>
    %cst_87 = arith.constant dense<0.000000e+00> : vector<288x128xf32>
    %63 = tpu.matmul %59, %62, %cst_87 {dimension_numbers = #tpu.dot_dimension_numbers<[1], [0], [0], [1], [0, 0, 1, 1], [], []>} : vector<288x4xbf16>, vector<4x128xbf16>, vector<288x128xf32> -> vector<288x128xf32>
    %64 = arith.addf %60, %63 : vector<288x128xf32>
    %c0_88 = arith.constant 0 : index
    %c0_89 = arith.constant 0 : index
    %65 = vector.load %arg7[%c0_88, %c0_89] : memref<288x128xf32, #tpu.memory_space<vmem>>, vector<288x128xf32>
    tpu.vector_store %arg7[%c0_88, %c0_89], %64 {strides = array<i32>} : memref<288x128xf32, #tpu.memory_space<vmem>>, vector<288x128xf32>,
    %c0_90 = arith.constant 0 : index
    %c38 = arith.constant 38 : index
    %c0_91 = arith.constant 0 : index
    %66 = vector.load %arg3[%c0_90, %c38, %c0_91] : memref<1x342x4xbf16, #tpu.memory_space<vmem>>, vector<1x288x4xbf16>
    %67 = vector.shape_cast %66 : vector<1x288x4xbf16> to vector<288x4xbf16>
    %c0_92 = arith.constant 0 : index
    %c0_93 = arith.constant 0 : index
    %68 = vector.load %arg7[%c0_92, %c0_93] : memref<288x128xf32, #tpu.memory_space<vmem>>, vector<288x128xf32>
    %c2_94 = arith.constant 2 : index
    %c2_95 = arith.constant 2 : index
    %c0_96 = arith.constant 0 : index
    %c0_97 = arith.constant 0 : index
    %69 = vector.load %arg4[%c2_94, %c2_95, %c0_96, %c0_97] : memref<3x3x4x128xbf16, #tpu.memory_space<vmem>>, vector<1x1x4x128xbf16>
    %70 = vector.shape_cast %69 : vector<1x1x4x128xbf16> to vector<4x128xbf16>
    %cst_98 = arith.constant dense<0.000000e+00> : vector<288x128xf32>
    %71 = tpu.matmul %67, %70, %cst_98 {dimension_numbers = #tpu.dot_dimension_numbers<[1], [0], [0], [1], [0, 0, 1, 1], [], []>} : vector<288x4xbf16>, vector<4x128xbf16>, vector<288x128xf32> -> vector<288x128xf32>
    %72 = arith.addf %68, %71 : vector<288x128xf32>
    %c0_99 = arith.constant 0 : index
    %c0_100 = arith.constant 0 : index
    %73 = vector.load %arg7[%c0_99, %c0_100] : memref<288x128xf32, #tpu.memory_space<vmem>>, vector<288x128xf32>
    tpu.vector_store %arg7[%c0_99, %c0_100], %72 {strides = array<i32>} : memref<288x128xf32, #tpu.memory_space<vmem>>, vector<288x128xf32>,
    %c0_101 = arith.constant 0 : index
    %c0_102 = arith.constant 0 : index
    %74 = vector.load %arg7[%c0_101, %c0_102] : memref<288x128xf32, #tpu.memory_space<vmem>>, vector<288x128xf32>
    %c0_103 = arith.constant 0 : index
    %c0_104 = arith.constant 0 : index
    %75 = vector.load %arg5[%c0_103, %c0_104] : memref<1x128xf32, #tpu.memory_space<vmem>>, vector<1x128xf32>
    %76 = vector.broadcast %75 : vector<1x128xf32> to vector<288x128xf32>
    %77 = arith.addf %74, %76 : vector<288x128xf32>
    %cst_105 = arith.constant 0.000000e+00 : f32
    %78 = vector.broadcast %cst_105 : f32 to vector<288x128xf32>
    %79 = arith.maximumf %77, %78 : vector<288x128xf32>
    %c0_106 = arith.constant 0 : index
    %c0_107 = arith.constant 0 : index
    %c0_108 = arith.constant 0 : index
    %80 = vector.load %arg6[%c0_106, %c0_107, %c0_108] : memref<1x288x128xf32, #tpu.memory_space<vmem>>, vector<1x288x128xf32>
    %81 = vector.shape_cast %80 : vector<1x288x128xf32> to vector<288x128xf32>
    %82 = vector.shape_cast %79 : vector<288x128xf32> to vector<1x288x128xf32>
    tpu.vector_store %arg6[%c0_106, %c0_107, %c0_108], %82 {strides = array<i32>} : memref<1x288x128xf32, #tpu.memory_space<vmem>>, vector<1x288x128xf32>,
    return
  }
  func.func @transform_0(%arg0: i32, %arg1: i32, %arg2: i32) -> (i32, i32, i32) {
    %c0_i32 = arith.constant 0 : i32
    %c0_i32_0 = arith.constant 0 : i32
    %c0_i32_1 = arith.constant 0 : i32
    return %arg0, %c0_i32, %c0_i32_0 : i32, i32, i32
  }
  func.func @transform_1(%arg0: i32, %arg1: i32, %arg2: i32) -> (i32, i32, i32, i32) {
    %c0_i32 = arith.constant 0 : i32
    %c0_i32_0 = arith.constant 0 : i32
    %c0_i32_1 = arith.constant 0 : i32
    %c0_i32_2 = arith.constant 0 : i32
    return %c0_i32, %c0_i32_0, %c0_i32_1, %arg1 : i32, i32, i32, i32
  }
  func.func @transform_2(%arg0: i32, %arg1: i32, %arg2: i32) -> (i32, i32) {
    %c0_i32 = arith.constant 0 : i32
    %c0_i32_0 = arith.constant 0 : i32
    return %c0_i32, %arg1 : i32, i32
  }
  func.func @transform_3(%arg0: i32, %arg1: i32, %arg2: i32) -> (i32, i32, i32) {
    %c0_i32 = arith.constant 0 : i32
    return %arg0, %arg2, %arg1 : i32, i32, i32
  }
}

</mosaic_0001>

<bundles_post_ra>
// kernel: tpu_custom_call.1
= control target key start
LH: loop header
LB: loop body
LE: loop exit
PB: predicated region body
PF: predicated region fallthrough
CT: control target
= control target key end

     0   :  { %8 = vsyncpa [#allocation4], 0  ;;  %s7752_s0 = inlined_call_operand.vmem [shape: bf16[2,342,4], index: 0, kind: input, shape index: {}]   ;;  %s7753_s1 = inlined_call_operand.vmem [shape: bf16[3,3,4,128], index: 1, kind: input, shape index: {}]   ;;  %s7754_s2 = inlined_call_operand.vmem [shape: f32[1,128], index: 2, kind: input, shape index: {}]   ;;  %s7755_s3 = inlined_call_operand.hbm [shape: f32[2,288,128], index: 3, kind: output, shape index: {}]  }
   0x1   :  { %10 = vsyncpa [#allocation4 + $0x1], 0  ;;  %s6974_s12 = smov 0   ;;  %s6976_s13 = smov 0  }
   0x2   :  { %s6978_s14 = smov 0   ;;  %s6980_s15 = smov 0  }
   0x3   :  { %s6982_s16 = smov 0   ;;  %s6984_s17 = smov 0  }
   0x4 LB: > { %s5475_s18 = sadd.s32 4294967295, %s6949_s17   ;;  %s5476_s19 = sadd.s32 4294967294, %s6949_s17   ;;  %s6949_s17 = sphi %s6984_s17, %s16_s17   ;;  %s6945_s16 = sphi %s6982_s16, %s7762_s16   ;;  %s6941_s15 = sphi %s6980_s15, %s7761_s15   ;;  %s6937_s14 = sphi %s6978_s14, %s7760_s14   ;;  %s6933_s13 = sphi %s6976_s13, %s7759_s13   ;;  %s6929_s12 = sphi %s6974_s12, %s7758_s12  }
   0x5   : > { %s35_s20 = sadd.s32 1, %s6945_s16  ;;  %s124_s21 = sadd.s32 1, %s6937_s14 }
   0x6   : > { %p37_p0 = scmp.ge.s32.totalorder %s35_s20, 2  ;;  %p134_p1 = scmp.ne.s32.totalorder %s6937_s14, %s6933_s13 }
   0x7   : > { %p135_p2 = scmp.eq.s32.totalorder %s5475_s18, 1  ;;  %p140_p3 = scmp.ne.s32.totalorder %s6933_s13, %s6929_s12 }
   0x8   : > { %s7764_s20 = smov (%p37_p0, %s35_s20), 0  ;;  %p141_p5 = scmp.eq.s32.totalorder %s5476_s19, 1 }
   0x9   : > { %p7014_p4 = por %p135_p2, %p134_p1  ;;  %s117_s23 = ssub.s32 %s6945_s16, %s7764_s20 }
   0xa   : > { %p5481_p6 = scmp.ge.s32.totalorder %s6949_s17, 1  ;;  %p122_p7 = scmp.eq.s32.totalorder %s117_s23, 0 }
   0xb   : > { %p7021_p8 = por %p141_p5, %p140_p3  ;;  %p180_p9 = scmp.lt.s32.totalorder %s6949_s17, 3 }
   0xc   : > { %s7027_s25 = scalar_select %p122_p7, %s6937_s14, %s124_s21  }
   0xd   : > { %p181_p10 = pnand %p5481_p6, %p180_p9 }
   0xe   : > { %v333_v0 = vld [vmem:[%s7753_s1] sm:$0x3] (!%p181_p10)  ;;  %vm479_vm0 = vcmask (!%p181_p10), 1041408   ;;  %p211_p11 = scmp.lt.s32.totalorder (!%p181_p10), %s6941_s15, 1  ;;  %v5633_v2 = vld [vmem:[%s7753_s1 + $0x8] sm:$0x3] (!%p181_p10) }
   0xf   : > { %184 = sbr.rel (%p181_p10) target bundleno = 593 (0x251), region = 32  ;;  %6630 = vmatprep.subr.msk.bf16.mxu1 (!%p181_p10), %vm479_vm0, %v333_v0  ;;  %v481_v1 = vsel (!%p181_p10), %vm479_vm0, %v333_v0, 0  ;;  %6634 = vmatprep.subr.msk.bf16.mxu0 (!%p181_p10), %vm479_vm0, %v5633_v2  ;;  %v7041_v3 = vsel (!%p181_p10), %vm479_vm0, %v5633_v2, 0  ;;  %v5671_v4 = vld [vmem:[%s7753_s1 + $0xa] sm:$0x3] (!%p181_p10)  ;;  %vm424_vm1 = vcmask (!%p181_p10), 31744  }
  0x10   : > { %5999 = vmatpush3.bf16.msra.mxu1 (!%p181_p10), %v481_v1  ;;  %v5519_v5 = vld [vmem:[%s7753_s1 + $0x2] sm:$0x3] (!%p181_p10)  ;;  %6151 = vmatpush3.bf16.msra.mxu0 (!%p181_p10), %v7041_v3  ;;  %vm2546_vm2 = vsmask.f32 (!%p181_p10), 6400  ;;  %v7061_v7 = vld [vmem:[%s7753_s1 + $0x4] sm:$0x3] (!%p181_p10) }
  0x11   : > { %6631 = vmatprep.subr.msk.bf16.mxu1 (!%p181_p10), %vm479_vm0, %v5519_v5  ;;  %6636 = vmatprep.subr.msk.bf16.mxu0 (!%p181_p10), %vm479_vm0, %v5671_v4  ;;  %v1104_v9 = vsel (!%p181_p10), %vm479_vm0, %v5519_v5, 0  ;;  %v3284_v18 = vsel (!%p181_p10), %vm479_vm0, %v5671_v4, 0  ;;  %v7086_v40 = vld [vmem:[%s7753_s1 + $0xc] sm:$0x3] (!%p181_p10)  ;;  %vm3191_vm3 = vcmask (!%p181_p10), 1045504   ;;  %vm1523_vm5 = vcmask (!%p181_p10), 1046528  }
  0x12   : > { %vm900_vm4 = vsmask.f32 (!%p181_p10), 7424  ;;  %vm4214_vm6 = vsmask.f32 (!%p181_p10), 5376  ;;  %vm4859_vm7 = vcmask (!%p181_p10), 1044480   ;;  %s208_s7 = sand.u32 (!%p181_p10), 1, %s6933_s13  }
  0x13   : > { %s6642_s18 = smul.u32 (!%p181_p10), 4608, %s6941_s15  ;;  %s6951_s28 = smov (!%p181_p10), [#allocation3]  }
  0x14   : > { %s6875_s29 = sshll.u32 (!%p181_p10), %s6951_s28, 4  ;;  %s6876_s29 = int_to_ptr.vmem [resolvable:$false] %s6875_s29 }
  0x15   : > { %s7697_s26 = scalar_lea.hbm (!%p181_p10), %s7755_s3, %s6642_s18 }
  0x16   : > { %s212_s30 = scalar_select %p211_p11, %s6941_s15, 1 }
  0x17   : > { %s7706_s15 = scalar_lea.sflag [#allocation4], %s208_s7 }
  0x18   : > { %s6641_s8 = smul.u32 172, %s212_s30  ;;  %s6877_s30 = scalar_lea.vmem %s6876_s29, 9216 }
  0x1a   : > { %s7055_s11 = scalar_lea.vmem %s7752_s0, %s6641_s8  ;;  %s6640_s8 = smul.u32 288, %s208_s7 }
  0x1b   : > { %v6700_v6 = vld [vmem:[%s7055_s11] sm:$0xff]   ;;  %v6701_v8 = vld [vmem:[%s7055_s11 + $0x8] sm:$0xff]   ;;  %v6703_v11 = vld [vmem:[%s7055_s11 + $0x10] sm:$0xff]  }
  0x1c   : > { %6000 = vmatprep.mubr.msk.bf16.mxu1 %vm424_vm1, %v6700_v6  ;;  %v6702_v10 = vld [vmem:[%s7055_s11 + $0x8] sm:$0xfe]   ;;  %v6704_v12 = vld [vmem:[%s7055_s11 + $0x10] sm:$0xff]   ;;  %v2556_v15 = vshrl.u32 %v6703_v11, 16  ;;  %v2559_v16 = vshll.u32 %v6703_v11, 16  ;;  %v6705_v17 = vld [vmem:[%s7055_s11 + $0x18] sm:$0xff]  }
  0x1d   : > { %6001 = vmatmul.mubr.msk.bf16.vlgmr.msra.gmra.mrb[0].mxu1 %vm424_vm1, %v6701_v8  ;;  %v2548_v13 = vshrl.u32 %v6702_v10, 16  ;;  %v2551_v14 = vshll.u32 %v6702_v10, 16  ;;  %v2565_v23 = vshrl.u32 %v6705_v17, 16  ;;  %v2568_v24 = vshll.u32 %v6705_v17, 16  ;;  %v6706_v25 = vld [vmem:[%s7055_s11 + $0x18] sm:$0xff]   ;;  %v6707_v26 = vld [vmem:[%s7055_s11 + $0x20] sm:$0xff]  }
  0x1e   : > { %6037 = vmatpush3.bf16.msra.mxu1 %v1104_v9  ;;  %6004 = vmatprep.mubr.msk.bf16.mxu1 %vm424_vm1, %v6704_v12  ;;  %v2558_v21 = vrot.slane %v2556_v15, 1  ;;  %v2561_v22 = vrot.slane %v2559_v16, 2  ;;  %v2574_v31 = vshrl.u32 %v6707_v26, 16  ;;  %v2577_v32 = vshll.u32 %v6707_v26, 16  ;;  %v6708_v33 = vld [vmem:[%s7055_s11 + $0x20] sm:$0xff]   ;;  %v6709_v34 = vld [vmem:[%s7055_s11 + $0x28] sm:$0xff]  }
  0x1f   : > { %6632 = vmatprep.subr.msk.bf16.mxu1 %vm479_vm0, %v7061_v7  ;;  %v2550_v19 = vrot.slane %v2548_v13, 1  ;;  %v2553_v20 = vrot.slane %v2551_v14, 2  ;;  %v2567_v29 = vrot.slane %v2565_v23, 1  ;;  %v2570_v30 = vrot.slane %v2568_v24, 2  ;;  %v6710_v42 = vld [vmem:[%s7055_s11 + $0x28] sm:$0xff]   ;;  %v6711_v43 = vld [vmem:[%s7055_s11 + $0x30] sm:$0xff]  }
  0x20   : > { %v2562_v28 = vor.u32 %v2561_v22, %v2558_v21  ;;  %v2576_v37 = vrot.slane %v2574_v31, 1  ;;  %v2579_v38 = vrot.slane %v2577_v32, 2  ;;  %v2583_v39 = vshrl.u32 %v6709_v34, 16  ;;  %v6712_v47 = vld [vmem:[%s7055_s11 + $0x30] sm:$0xff]   ;;  %v6713_v51 = vld [vmem:[%s7055_s11 + $0x38] sm:$0xff]   ;;  %v6715_v58 = vld [vmem:[%s7055_s11 + $0x40] sm:$0xff]  }
  0x21   : > { %v2554_v27 = vor.u32 %v2553_v20, %v2550_v19  ;;  %v2571_v36 = vor.u32 %v2570_v30, %v2567_v29  ;;  %v2586_v41 = vshll.u32 %v6709_v34, 16  ;;  %v2592_v49 = vshrl.u32 %v6711_v43, 16  ;;  %v6717_v1 = vld [vmem:[%s7055_s11 + $0x48] sm:$0xff]   ;;  %v6714_v4 = vld [vmem:[%s7055_s11 + $0x38] sm:$0xff]   ;;  %v6719_v8 = vld [vmem:[%s7055_s11 + $0x50] sm:$0xff]  }
  0x22   : > { %v2580_v45 = vor.u32 %v2579_v38, %v2576_v37  ;;  %v2585_v46 = vrot.slane %v2583_v39, 1  ;;  %v2595_v50 = vshll.u32 %v6711_v43, 16  ;;  %v2601_v56 = vshrl.u32 %v6713_v51, 16  ;;  %v6716_v12 = vld [vmem:[%s7055_s11 + $0x40] sm:$0xff]   ;;  %v6718_v23 = vld [vmem:[%s7055_s11 + $0x48] sm:$0xff]   ;;  %v6720_v24 = vld [vmem:[%s7055_s11 + $0x50] sm:$0xff]  }
  0x23   : > { %v2563_v35 = vsel %vm2546_vm2, %v2554_v27, %v2562_v28  ;;  %v2572_v44 = vsel %vm2546_vm2, %v2562_v28, %v2571_v36  ;;  %v2588_v48 = vrot.slane %v2586_v41, 2  ;;  %v2594_v54 = vrot.slane %v2592_v49, 1  ;;  %v6724_v29 = vld [vmem:[%s7055_s11 + $0x10] sm:$0xff]   ;;  %v6723_v34 = vld [vmem:[%s7055_s11 + $0x8] sm:$0xfc]   ;;  %v6725_v37 = vld [vmem:[%s7055_s11 + $0x60] sm:$0xff]  }
  0x24   : > { %6152 = vmatprep.mubr.msk.bf16.mxu0 %vm424_vm1, %v2563_v35  ;;  %v2581_v52 = vsel %vm2546_vm2, %v2571_v36, %v2580_v45  ;;  %v2597_v55 = vrot.slane %v2595_v50, 2  ;;  %v2604_v57 = vshll.u32 %v6713_v51, 16  ;;  %v2603_v60 = vrot.slane %v2601_v56, 1  ;;  %v6722_v35 = vld [vmem:[%s7055_s11 + $0x58] sm:$0xff]   ;;  %v6737_v49 = vld [vmem:[%s7055_s11] sm:$0xff]   ;;  %v6730_v50 = vld [vmem:[%s7055_s11 + $0x28] sm:$0xff]  }
  0x25   : > { %6005 = vmatmul.mubr.msk.bf16.gmra.mrb[4].mxu1 %vm424_vm1, %v6706_v25  ;;  %6153 = vmatmul.mubr.msk.bf16.vlgmr.msra.gmra.mrb[0].mxu0 %vm424_vm1, %v2572_v44  ;;  %v2589_v53 = vor.u32 %v2588_v48, %v2585_v46  ;;  %v2610_v63 = vshrl.u32 %v6715_v58, 16  ;;  %v2613_v0 = vshll.u32 %v6715_v58, 16  ;;  %v2619_v9 = vshrl.u32 %v6717_v1, 16  ;;  %v6728_v44 = vld [vmem:[%s7055_s11 + $0x20] sm:$0xff]  }
  0x26   : > { %6008 = vmatprep.mubr.msk.bf16.mxu1 %vm424_vm1, %v6708_v33  ;;  %6189 = vmatpush3.bf16.msra.mxu0 %v3284_v18  ;;  %v2598_v59 = vor.u32 %v2597_v55, %v2594_v54  ;;  %v2606_v62 = vrot.slane %v2604_v57, 2  ;;  %v2622_v10 = vshll.u32 %v6717_v1, 16  ;;  %v2628_v14 = vshrl.u32 %v6719_v8, 16  ;;  %v6721_v18 = vld [vmem:[%s7055_s11 + $0x58] sm:$0xff]   ;;  %v6732_v55 = vld [vmem:[%s7055_s11 + $0x30] sm:$0xff]  }
  0x27   : > { %6156 = vmatprep.mubr.msk.bf16.mxu0 %vm424_vm1, %v2581_v52  ;;  %6637 = vmatprep.subr.msk.bf16.mxu0 %vm479_vm0, %v7086_v40  ;;  %v2590_v61 = vsel %vm2546_vm2, %v2580_v45, %v2589_v53  ;;  %v2612_v5 = vrot.slane %v2610_v63, 1  ;;  %v2615_v6 = vrot.slane %v2613_v0, 2  ;;  %v2631_v15 = vshll.u32 %v6719_v8, 16  ;;  %v6727_v45 = vld [vmem:[%s7055_s11 + $0x68] sm:$0xff]   ;;  %v6734_v0 = vld [vmem:[%s7055_s11 + $0x38] sm:$0xff]   ;;  %v6740_v1 = vld [vmem:[%s7055_s11 + $0x10] sm:$0xff]  }
  0x28   : > { %v2599_v2 = vsel %vm2546_vm2, %v2589_v53, %v2598_v59  ;;  %v2607_v11 = vor.u32 %v2606_v62, %v2603_v60  ;;  %v2621_v16 = vrot.slane %v2619_v9, 1  ;;  %v2624_v17 = vrot.slane %v2622_v10, 2  ;;  %v6738_v53 = vld [vmem:[%s7055_s11 + $0x8] sm:$0xff]  }
  0x29   : > { %v2616_v13 = vor.u32 %v2615_v6, %v2612_v5  ;;  %v2630_v21 = vrot.slane %v2628_v14, 1  ;;  %v2633_v22 = vrot.slane %v2631_v15, 2  ;;  %v2637_v26 = vshrl.u32 %v6721_v18, 16  ;;  %v7154_v57 = vld [vmem:[%s7753_s1 + $0xe] sm:$0x3]  ;;  %v6742_v6 = vld [vmem:[%s7055_s11 + $0x18] sm:$0xff]  }
  0x2a   : > { %v2608_v19 = vsel %vm2546_vm2, %v2598_v59, %v2607_v11  ;;  %v2625_v25 = vor.u32 %v2624_v17, %v2621_v16  ;;  %v2640_v27 = vshll.u32 %v6721_v18, 16  ;;  %v3192_v38 = vrot.slane %v6723_v34, 2  ;;  %v6731_v59 = vld [vmem:[%s7055_s11 + $0x78] sm:$0xff]   ;;  %v6735_v10 = vld [vmem:[%s7055_s11 + $0x88] sm:$0xff]  }
  0x2b   : > { %v2617_v20 = vsel %vm2546_vm2, %v2607_v11, %v2616_v13  ;;  %v2634_v28 = vor.u32 %v2633_v22, %v2630_v21  ;;  %v2639_v31 = vrot.slane %v2637_v26, 1  ;;  %v3193_v39 = vrot.slane %v6724_v29, 2  ;;  %v6739_v18 = vld [vmem:[%s7055_s11 + $0x48] sm:$0xff]  }
  0x2c   : > { %v2626_v30 = vsel %vm2546_vm2, %v2616_v13, %v2625_v25  ;;  %v2642_v32 = vrot.slane %v2640_v27, 2  ;;  %v3197_v48 = vrot.slane %v6728_v44, 2  ;;  %v3795_v52 = vsel %vm479_vm0, %v7086_v40, 0  ;;  %v6733_v40 = vld [vmem:[%s7055_s11 + $0x80] sm:$0xff]   ;;  %v6746_v27 = vld [vmem:[%s7055_s11 + $0x28] sm:$0xff]   ;;  %v6750_v44 = vld [vmem:[%s7055_s11 + $0x38] sm:$0xff]  }
  0x2d   : > { %6009 = vmatmul.mubr.msk.bf16.gmra.mrb[8].mxu1 %vm424_vm1, %v6710_v42  ;;  %6157 = vmatmul.mubr.msk.bf16.gmra.mrb[4].mxu0 %vm424_vm1, %v2590_v61  ;;  %v2635_v33 = vsel %vm2546_vm2, %v2625_v25, %v2634_v28  ;;  %v6726_v42 = vld [vmem:[%s7055_s11 + $0x18] sm:$0xff]   ;;  %v3194_v43 = vsel %vm3191_vm3, %v3192_v38, %v3193_v39  ;;  %v904_v56 = vshll.u32 %v6737_v49, 16  ;;  %v3199_v58 = vrot.slane %v6730_v50, 2 }
  0x2e   : > { %6012 = vmatprep.mubr.msk.bf16.mxu1 %vm424_vm1, %v6712_v47  ;;  %6160 = vmatprep.mubr.msk.bf16.mxu0 %vm424_vm1, %v2599_v2  ;;  %v7127_v36 = vor.u32 %v2642_v32, %v2639_v31  ;;  %v3195_v46 = vrot.slane %v6726_v42, 2  ;;  %v6729_v47 = vld [vmem:[%s7055_s11 + $0x70] sm:$0xff]   ;;  %v909_v60 = vshll.u32 %v6738_v53, 16  ;;  %v3201_v61 = vrot.slane %v6732_v55, 2  ;;  %v6743_v38 = vld [vmem:[%s7055_s11 + $0x58] sm:$0xff]  }
  0x2f   : > { %v902_v62 = vshrl.u32 %v6737_v49, 16  ;;  %v906_v63 = vrot.slane %v904_v56, 1  ;;  %v3200_v2 = vsel %vm3191_vm3, %v3197_v48, %v3199_v58  ;;  %v917_v11 = vshll.u32 %v6740_v1, 16  ;;  %v6747_v56 = vld [vmem:[%s7055_s11 + $0x68] sm:$0xff]  }
  0x30   : > { %v2644_v41 = vsel %vm2546_vm2, %v2634_v28, %v7127_v36  ;;  %v3196_v51 = vsel %vm3191_vm3, %v3193_v39, %v3195_v46  ;;  %v3198_v54 = vsel %vm3191_vm3, %v3195_v46, %v3197_v48  ;;  %v911_v5 = vrot.slane %v909_v60, 1 }
  0x31   : > { %v3202_v8 = vsel %vm3191_vm3, %v3199_v58, %v3201_v61  ;;  %v907_v9 = vor.u32 %v906_v63, %v902_v62  ;;  %v913_v13 = vshrl.u32 %v6738_v53, 16  ;;  %v921_v16 = vshrl.u32 %v6740_v1, 16  ;;  %v6754_v1 = vld [vmem:[%s7055_s11 + $0x48] sm:$0xff]  }
  0x32   : > { %v925_v17 = vshll.u32 %v6742_v6, 16  ;;  %v1616_v28 = vsel %vm479_vm0, %v7061_v7, 0  ;;  %v3207_v29 = vrot.slane %v6739_v18, 2  ;;  %v6745_v7 = vld [vmem:[%s7055_s11 + $0x60] sm:$0xff]   ;;  %v3211_v48 = vrot.slane %v6743_v38, 2 }
  0x33   : > { %v912_v15 = vsel %vm900_vm4, %v907_v9, %v911_v5  ;;  %v915_v22 = vor.u32 %v913_v13, %v911_v5  ;;  %v3213_v49 = vrot.slane %v6745_v7, 2 }
  0x34   : > { %v927_v26 = vrot.slane %v925_v17, 1  ;;  %v6753_v17 = vld [vmem:[%s7055_s11 + $0x80] sm:$0xff]  }
  0x35   : > { %6013 = vmatmul.mubr.msk.bf16.gmra.mrb[12].mxu1 %vm424_vm1, %v6714_v4  ;;  %6161 = vmatmul.mubr.msk.bf16.gmra.mrb[8].mxu0 %vm424_vm1, %v2608_v19  ;;  %v6736_v4 = vld [vmem:[%s7055_s11 + $0x40] sm:$0xff]   ;;  %v919_v19 = vrot.slane %v917_v11, 1  ;;  %v3214_v62 = vsel %vm3191_vm3, %v3211_v48, %v3213_v49  ;;  %v973_v11 = vshll.u32 %v6754_v1, 16 }
  0x36   : > { %6016 = vmatprep.mubr.msk.bf16.mxu1 %vm424_vm1, %v6716_v12  ;;  %6164 = vmatprep.mubr.msk.bf16.mxu0 %vm424_vm1, %v2617_v20  ;;  %v3203_v12 = vrot.slane %v6734_v0, 2  ;;  %v3205_v14 = vrot.slane %v6736_v4, 2  ;;  %v6744_v20 = vld [vmem:[%s7055_s11 + $0x20] sm:$0xff]  }
  0x37   : > { %v923_v25 = vor.u32 %v921_v16, %v919_v19  ;;  %v920_v31 = vsel %vm900_vm4, %v915_v22, %v919_v19  ;;  %v7223_v22 = vld [vmem:[%s7753_s1 + $0x6] sm:$0x3] }
  0x38   : > { %v3204_v21 = vsel %vm3191_vm3, %v3201_v61, %v3203_v12  ;;  %v3208_v42 = vsel %vm3191_vm3, %v3205_v14, %v3207_v29  ;;  %v6749_v61 = vld [vmem:[%s7055_s11 + $0x70] sm:$0xff]  }
  0x39   : > { %v928_v34 = vsel %vm900_vm4, %v923_v25, %v927_v26 }
  0x3d   : > { %6017 = vmatmul.mubr.msk.bf16.gmra.mrb[16].mxu1 %vm424_vm1, %v6718_v23  ;;  %6165 = vmatmul.mubr.msk.bf16.gmra.mrb[12].mxu0 %vm424_vm1, %v2626_v30  ;;  %v6741_v23 = vld [vmem:[%s7055_s11 + $0x50] sm:$0xff]   ;;  %v933_v30 = vshll.u32 %v6744_v20, 16 }
  0x3e   : > { %6020 = vmatprep.mubr.msk.bf16.mxu1 %vm424_vm1, %v6720_v24  ;;  %6168 = vmatprep.mubr.msk.bf16.mxu0 %vm424_vm1, %v2635_v33  ;;  %v3206_v24 = vsel %vm3191_vm3, %v3203_v12, %v3205_v14  ;;  %v3209_v32 = vrot.slane %v6741_v23, 2  ;;  %v929_v33 = vshrl.u32 %v6742_v6, 16  ;;  %v3217_v6 = vrot.slane %v6749_v61, 2  ;;  %v6751_v12 = vld [vmem:[%s7055_s11 + $0x78] sm:$0xff]   ;;  %v6756_v14 = vld [vmem:[%s7055_s11 + $0x50] sm:$0xff]  }
  0x3f   : > { %v935_v39 = vrot.slane %v933_v30, 1  ;;  %v981_v23 = vshll.u32 %v6756_v14, 16 }
  0x45   : > { %6021 = vmatmul.mubr.msk.bf16.gmra.mrb[20].mxu1 %vm424_vm1, %v6722_v35  ;;  %6169 = vmatmul.mubr.msk.bf16.gmra.mrb[16].mxu0 %vm424_vm1, %v2644_v41  ;;  %v937_v35 = vshrl.u32 %v6744_v20, 16  ;;  %v6748_v41 = vld [vmem:[%s7055_s11 + $0x30] sm:$0xff]   ;;  %v975_v20 = vrot.slane %v973_v11, 1  ;;  %v6764_v11 = vld [vmem:[%s7055_s11 + $0x20] sm:$0xff]  }
  0x46   : > { %6024 = vmatprep.mubr.msk.bf16.mxu1 %vm424_vm1, %v6725_v37  ;;  %6190 = vmatprep.mubr.msk.bf16.mxu0 %vm424_vm1, %v3194_v43  ;;  %v941_v37 = vshll.u32 %v6746_v27, 16  ;;  %v931_v43 = vor.u32 %v929_v33, %v927_v26  ;;  %v949_v50 = vshll.u32 %v6748_v41, 16  ;;  %v953_v53 = vshrl.u32 %v6748_v41, 16  ;;  %v6760_v33 = vld [vmem:[%s7055_s11 + $0x60] sm:$0xff]   ;;  %v6763_v41 = vld [vmem:[%s7055_s11 + $0x68] sm:$0xff]  }
  0x47   : > { %v939_v46 = vor.u32 %v937_v35, %v935_v39  ;;  %v3221_v26 = vrot.slane %v6753_v17, 2  ;;  %v6771_v17 = vld [vmem:[%s7055_s11 + $0x88] sm:$0xff]  }
  0x48   : > { %v951_v58 = vrot.slane %v949_v50, 1  ;;  %v1005_v50 = vshll.u32 %v6763_v41, 16 }
  0x4a   : > { %v955_v63 = vor.u32 %v953_v53, %v951_v58 }
  0x4d   : > { %6025 = vmatmul.mubr.msk.bf16.gmra.mrb[24].mxu1 %vm424_vm1, %v6727_v45  ;;  %6191 = vmatmul.mubr.msk.bf16.vlgmr.msra.gmra.mrb[0].mxu0 %vm424_vm1, %v3196_v51  ;;  %v3210_v45 = vsel %vm3191_vm3, %v3207_v29, %v3209_v32  ;;  %v936_v51 = vsel %vm900_vm4, %v931_v43, %v935_v39  ;;  %v985_v29 = vshrl.u32 %v6756_v14, 16  ;;  %v997_v43 = vshll.u32 %v6760_v33, 16 }
  0x4e   : > { %6028 = vmatprep.mubr.msk.bf16.mxu1 %vm424_vm1, %v6729_v47  ;;  %6227 = vmatpush3.bf16.msra.mxu0 %v3795_v52  ;;  %v943_v47 = vrot.slane %v941_v37, 1  ;;  %v945_v52 = vshrl.u32 %v6746_v27, 16  ;;  %v977_v27 = vshrl.u32 %v6754_v1, 16  ;;  %v6757_v37 = vld [vmem:[%s7055_s11 + $0x90] sm:$0xff]   ;;  %v1009_v1 = vshrl.u32 %v6763_v41, 16 }
  0x4f   : > { %6194 = vmatprep.mubr.msk.bf16.mxu0 %vm424_vm1, %v3198_v54  ;;  %6638 = vmatprep.subr.msk.bf16.mxu0 %vm479_vm0, %v7154_v57  ;;  %v957_v54 = vshll.u32 %v6750_v44, 16 }
  0x50   : > { %v944_v55 = vsel %vm900_vm4, %v939_v46, %v943_v47  ;;  %v947_v60 = vor.u32 %v945_v52, %v943_v47  ;;  %v979_v35 = vor.u32 %v977_v27, %v975_v20  ;;  %v6765_v52 = vld [vmem:[%s7055_s11 + $0x70] sm:$0xff]  }
  0x51   : > { %v959_v0 = vrot.slane %v957_v54, 1  ;;  %v6768_v27 = vld [vmem:[%s7055_s11 + $0x30] sm:$0xff]  }
  0x52   : > { %v952_v5 = vsel %vm900_vm4, %v947_v60, %v951_v58  ;;  %v6761_v58 = vld [vmem:[%s7055_s11 + $0x10] sm:$0xfc]   ;;  %v6767_v60 = vld [vmem:[%s7055_s11 + $0x78] sm:$0xff]  }
  0x53   : > { %v960_v9 = vsel %vm900_vm4, %v955_v63, %v959_v0 }
  0x55   : > { %6029 = vmatmul.mubr.msk.bf16.gmra.mrb[28].mxu1 %vm424_vm1, %v6731_v59  ;;  %6195 = vmatmul.mubr.msk.bf16.gmra.mrb[4].mxu0 %vm424_vm1, %v3200_v2  ;;  %v6752_v59 = vld [vmem:[%s7055_s11 + $0x40] sm:$0xff]   ;;  %v3215_v2 = vrot.slane %v6747_v56, 2 }
  0x56   : > { %6032 = vmatprep.mubr.msk.bf16.mxu1 %vm424_vm1, %v6733_v40  ;;  %6198 = vmatprep.mubr.msk.bf16.mxu0 %vm424_vm1, %v3202_v8  ;;  %v3212_v40 = vsel %vm3191_vm3, %v3209_v32, %v3211_v48  ;;  %v965_v4 = vshll.u32 %v6752_v59, 16  ;;  %v961_v8 = vshrl.u32 %v6750_v44, 16  ;;  %v983_v32 = vrot.slane %v981_v23, 1  ;;  %v6759_v48 = vld [vmem:[%s7055_s11 + $0x98] ss:$0 sps:$4 sm:$0x33]  }
  0x57   : > { %v3218_v18 = vsel %vm3191_vm3, %v3215_v2, %v3217_v6  ;;  %v3227_v61 = vrot.slane %v6759_v48, 2  ;;  %v1025_v23 = vshrl.u32 %v6767_v60, 16 }
  0x58   : > { %v967_v13 = vrot.slane %v965_v4, 1  ;;  %v963_v16 = vor.u32 %v961_v8, %v959_v0  ;;  %v987_v39 = vor.u32 %v985_v29, %v983_v32  ;;  %v984_v44 = vsel %vm900_vm4, %v979_v35, %v983_v32  ;;  %v6769_v8 = vld [vmem:[%s7055_s11 + $0x80] sm:$0xff]   ;;  %v6773_v29 = vld [vmem:[%s7055_s11 + $0x90] ss:$0 sps:$4 sm:$0x11]   ;;  %v6770_v32 = vld [vmem:[%s7055_s11 + $0x38] sm:$0xff]  }
  0x59   : > { %v3712_v41 = vrot.slane %v6770_v32, 2  ;;  %v6790_v32 = vld [vmem:[%s7055_s11 + $0x40] sm:$0xff]  }
  0x5a   : > { %v968_v25 = vsel %vm900_vm4, %v963_v16, %v967_v13 }
  0x5d   : > { %6033 = vmatmul.mubr.msk.bf16.gmra.mrb[32].mxu1 %vm424_vm1, %v6735_v10  ;;  %6199 = vmatmul.mubr.msk.bf16.gmra.mrb[8].mxu0 %vm424_vm1, %v3204_v21  ;;  %v969_v10 = vshrl.u32 %v6752_v59, 16  ;;  %v6758_v21 = vld [vmem:[%s7055_s11 + $0x58] sm:$0xff]  }
  0x5e   : > { %6038 = vmatprep.mubr.msk.bf16.mxu1 %vm424_vm1, %v912_v15  ;;  %6202 = vmatprep.mubr.msk.bf16.mxu0 %vm424_vm1, %v3206_v24  ;;  %v3216_v15 = vsel %vm3191_vm3, %v3213_v49, %v3215_v2  ;;  %v3219_v24 = vrot.slane %v6751_v12, 2  ;;  %v989_v30 = vshll.u32 %v6758_v21, 16  ;;  %v993_v46 = vshrl.u32 %v6758_v21, 16 }
  0x5f   : > { %v971_v19 = vor.u32 %v969_v10, %v967_v13  ;;  %v1001_v49 = vshrl.u32 %v6760_v33, 16  ;;  %v3703_v2 = vrot.slane %v6761_v58, 2  ;;  %v6766_v13 = vld [vmem:[%s7055_s11 + $0x28] sm:$0xff]   ;;  %v4440_v33 = vsel %vm479_vm0, %v7154_v57, 0 }
  0x60   : > { %v3222_v38 = vsel %vm3191_vm3, %v3219_v24, %v3221_v26  ;;  %v991_v7 = vrot.slane %v989_v30, 1  ;;  %v3708_v21 = vrot.slane %v6766_v13, 2 }
  0x62   : > { %v992_v47 = vsel %vm900_vm4, %v987_v39, %v991_v7  ;;  %v995_v54 = vor.u32 %v993_v46, %v991_v7  ;;  %v1045_v39 = vshll.u32 %v6773_v29, 16  ;;  %v3710_v7 = vrot.slane %v6768_v27, 2  ;;  %v6772_v46 = vld [vmem:[%s7055_s11 + $0x40] sm:$0xff]  }
  0x64   : > { %v3711_v48 = vsel %vm3191_vm3, %v3708_v21, %v3710_v7 }
  0x65   : > { %6039 = vmatmul.mubr.msk.bf16.vlgmr.msra.gmra.mrb[0].mxu1 %vm424_vm1, %v920_v31  ;;  %6203 = vmatmul.mubr.msk.bf16.gmra.mrb[12].mxu0 %vm424_vm1, %v3208_v42  ;;  %v6755_v31 = vld [vmem:[%s7055_s11 + $0x88] sm:$0xff]  }
  0x66   : > { %6042 = vmatprep.mubr.msk.bf16.mxu1 %vm424_vm1, %v928_v34  ;;  %6075 = vmatpush3.bf16.msra.mxu1 %v1616_v28  ;;  %v976_v28 = vsel %vm900_vm4, %v971_v19, %v975_v20  ;;  %v3220_v34 = vsel %vm3191_vm3, %v3217_v6, %v3219_v24  ;;  %v3223_v42 = vrot.slane %v6755_v31, 2  ;;  %v1021_v6 = vshll.u32 %v6767_v60, 16  ;;  %v6777_v60 = vld [vmem:[%s7055_s11 + $0x50] sm:$0xff]  }
  0x67   : > { %6206 = vmatprep.mubr.msk.bf16.mxu0 %vm424_vm1, %v3210_v45  ;;  %6633 = vmatprep.subr.msk.bf16.mxu1 %vm479_vm0, %v7223_v22  ;;  %v3225_v45 = vrot.slane %v6757_v37, 2  ;;  %v3706_v19 = vrot.slane %v6764_v11, 2 }
  0x68   : > { %v3224_v53 = vsel %vm3191_vm3, %v3221_v26, %v3223_v42  ;;  %v1023_v16 = vrot.slane %v1021_v6, 1  ;;  %v1037_v26 = vshll.u32 %v6771_v17, 16  ;;  %v6782_v6 = vld [vmem:[%s7055_s11 + $0x20] sm:$0xff]  }
  0x69   : > { %v3226_v56 = vsel %vm3191_vm3, %v3223_v42, %v3225_v45  ;;  %v3228_v10 = vsel %vm3191_vm3, %v3225_v45, %v3227_v61  ;;  %v1041_v42 = vshrl.u32 %v6771_v17, 16  ;;  %v6775_v45 = vld [vmem:[%s7055_s11] sm:$0xfe]   ;;  %v1531_v13 = vrot.slane %v6782_v6, 1 }
  0x6a   : > { %v1027_v31 = vor.u32 %v1025_v23, %v1023_v16  ;;  %v1039_v37 = vrot.slane %v1037_v26, 1  ;;  %v6788_v23 = vld [vmem:[%s7055_s11 + $0x38] sm:$0xff]   ;;  %v6802_v6 = vld [vmem:[%s7055_s11 + $0x20] sm:$0xff]  }
  0x6b   : > { %v1537_v29 = vrot.slane %v6788_v23, 1 }
  0x6d   : > { %6043 = vmatmul.mubr.msk.bf16.gmra.mrb[4].mxu1 %vm424_vm1, %v936_v51  ;;  %6207 = vmatmul.mubr.msk.bf16.gmra.mrb[16].mxu0 %vm424_vm1, %v3212_v40  ;;  %v999_v51 = vrot.slane %v997_v43, 1  ;;  %v1007_v40 = vrot.slane %v1005_v50, 1  ;;  %v6776_v43 = vld [vmem:[%s7055_s11 + $0x8] sm:$0xff]   ;;  %v3713_v50 = vsel %vm3191_vm3, %v3710_v7, %v3712_v41  ;;  %v1539_v7 = vrot.slane %v6790_v32, 1 }
  0x6e   : > { %6046 = vmatprep.mubr.msk.bf16.mxu1 %vm424_vm1, %v944_v55  ;;  %6210 = vmatprep.mubr.msk.bf16.mxu0 %vm424_vm1, %v3214_v62  ;;  %v6762_v55 = vld [vmem:[%s7055_s11 + $0x18] sm:$0xff]   ;;  %v1013_v62 = vshll.u32 %v6765_v52, 16 }
  0x6f   : > { %v1003_v59 = vor.u32 %v1001_v49, %v999_v51  ;;  %v1000_v63 = vsel %vm900_vm4, %v995_v54, %v999_v51  ;;  %v3704_v0 = vrot.slane %v6762_v55, 2  ;;  %v1011_v12 = vor.u32 %v1009_v1, %v1007_v40  ;;  %v6774_v51 = vld [vmem:[%s7055_s11 + $0x48] sm:$0xff]  }
  0x70   : > { %v1043_v49 = vor.u32 %v1041_v42, %v1039_v37  ;;  %v3714_v54 = vrot.slane %v6772_v46, 2  ;;  %v3716_v58 = vrot.slane %v6774_v51, 2 }
  0x71   : > { %v1008_v4 = vsel %vm900_vm4, %v1003_v59, %v1007_v40  ;;  %v3705_v14 = vsel %vm3191_vm3, %v3703_v2, %v3704_v0  ;;  %v3707_v30 = vsel %vm3191_vm3, %v3704_v0, %v3706_v19  ;;  %v6780_v40 = vld [vmem:[%s7055_s11 + $0x18] sm:$0xff]   ;;  %v3718_v2 = vrot.slane %v6777_v60, 2 }
  0x72   : > { %v3715_v61 = vsel %vm3191_vm3, %v3712_v41, %v3714_v54  ;;  %v3717_v0 = vsel %vm3191_vm3, %v3714_v54, %v3716_v58  ;;  %v1529_v1 = vrot.slane %v6780_v40, 1  ;;  %v6791_v41 = vld [vmem:[%s7055_s11 + $0x88] sm:$0xff]   ;;  %v6795_v54 = vld [vmem:[%s7055_s11 + $0x98] sm:$0xff]  }
  0x73   : > { %v3719_v11 = vsel %vm3191_vm3, %v3716_v58, %v3718_v2  ;;  %v3732_v46 = vrot.slane %v6791_v41, 2  ;;  %v6798_v58 = vld [vmem:[%s7055_s11 + $0x60] sm:$0xff]   ;;  %v6801_v40 = vld [vmem:[%s7055_s11 + $0x68] sm:$0xff]  }
  0x75   : > { %6047 = vmatmul.mubr.msk.bf16.gmra.mrb[8].mxu1 %vm424_vm1, %v952_v5  ;;  %6211 = vmatmul.mubr.msk.bf16.gmra.mrb[20].mxu0 %vm424_vm1, %v3216_v15  ;;  %v1017_v5 = vshrl.u32 %v6765_v52, 16  ;;  %v1524_v52 = vrot.slane %v6775_v45, 1  ;;  %v6794_v45 = vld [vmem:[%s7055_s11 + $0x50] sm:$0xff]  }
  0x76   : > { %6050 = vmatprep.mubr.msk.bf16.mxu1 %vm424_vm1, %v960_v9  ;;  %6214 = vmatprep.mubr.msk.bf16.mxu0 %vm424_vm1, %v3218_v18  ;;  %v1015_v9 = vrot.slane %v1013_v62, 1  ;;  %v1029_v18 = vshll.u32 %v6769_v8, 16  ;;  %v1543_v51 = vrot.slane %v6794_v45, 1 }
  0x78   : > { %v1019_v15 = vor.u32 %v1017_v5, %v1015_v9  ;;  %v1016_v20 = vsel %vm900_vm4, %v1011_v12, %v1015_v9  ;;  %v6784_v9 = vld [vmem:[%s7055_s11 + $0x28] sm:$0xff]   ;;  %v6781_v12 = vld [vmem:[%s7055_s11 + $0x60] sm:$0xff]  }
  0x79   : > { %v3722_v17 = vrot.slane %v6781_v12, 2  ;;  %v6804_v12 = vld [vmem:[%s7055_s11 + $0x28] sm:$0xff]  }
  0x7a   : > { %v1024_v24 = vsel %vm900_vm4, %v1019_v15, %v1023_v16  ;;  %v6783_v15 = vld [vmem:[%s7055_s11 + $0x68] sm:$0xff]   ;;  %v1533_v16 = vrot.slane %v6784_v9, 1 }
  0x7d   : > { %6051 = vmatmul.mubr.msk.bf16.gmra.mrb[12].mxu1 %vm424_vm1, %v968_v25  ;;  %6215 = vmatmul.mubr.msk.bf16.gmra.mrb[24].mxu0 %vm424_vm1, %v3220_v34  ;;  %v1033_v25 = vshrl.u32 %v6769_v8, 16  ;;  %v3709_v34 = vsel %vm3191_vm3, %v3706_v19, %v3708_v21  ;;  %v6786_v19 = vld [vmem:[%s7055_s11 + $0x30] sm:$0xff]   ;;  %v1534_v21 = vsel %vm1523_vm5, %v1531_v13, %v1533_v16 }
  0x7e   : > { %6054 = vmatprep.mubr.msk.bf16.mxu1 %vm424_vm1, %v976_v28  ;;  %6218 = vmatprep.mubr.msk.bf16.mxu0 %vm424_vm1, %v3222_v38  ;;  %v1031_v28 = vrot.slane %v1029_v18, 1  ;;  %v7280_v38 = vld [vmem:[%s7753_s1 + $0x10] sm:$0x3]  ;;  %v1532_v18 = vsel %vm1523_vm5, %v1529_v1, %v1531_v13  ;;  %v1535_v26 = vrot.slane %v6786_v19, 1  ;;  %v4236_v19 = vshll.u32 %v6802_v6, 16 }
  0x80   : > { %v1035_v35 = vor.u32 %v1033_v25, %v1031_v28  ;;  %v1032_v57 = vsel %vm900_vm4, %v1027_v31, %v1031_v28  ;;  %v6785_v25 = vld [vmem:[%s7055_s11 + $0x70] sm:$0xff]   ;;  %v6787_v28 = vld [vmem:[%s7055_s11 + $0x78] sm:$0xff]   ;;  %v1536_v31 = vsel %vm1523_vm5, %v1533_v16, %v1535_v26 }
  0x85   : > { %6055 = vmatmul.mubr.msk.bf16.gmra.mrb[16].mxu1 %vm424_vm1, %v984_v44  ;;  %6219 = vmatmul.mubr.msk.bf16.gmra.mrb[28].mxu0 %vm424_vm1, %v3224_v53  ;;  %v1040_v44 = vsel %vm900_vm4, %v1035_v35, %v1039_v37  ;;  %v1525_v53 = vrot.slane %v6776_v43, 1  ;;  %v6792_v35 = vld [vmem:[%s7055_s11 + $0x48] sm:$0xff]  }
  0x86   : > { %6058 = vmatprep.mubr.msk.bf16.mxu1 %vm424_vm1, %v992_v47  ;;  %6222 = vmatprep.mubr.msk.bf16.mxu0 %vm424_vm1, %v3226_v56  ;;  %v1047_v47 = vrot.slane %v1045_v39, 1  ;;  %v6778_v56 = vld [vmem:[%s7055_s11 + $0x10] sm:$0xff]   ;;  %v6789_v39 = vld [vmem:[%s7055_s11 + $0x80] sm:$0xff]   ;;  %v1541_v42 = vrot.slane %v6792_v35, 1 }
  0x87   : > { %v1526_v59 = vsel %vm1523_vm5, %v1524_v52, %v1525_v53  ;;  %v1527_v62 = vrot.slane %v6778_v56, 1  ;;  %v3730_v43 = vrot.slane %v6789_v39, 2  ;;  %v6800_v52 = vld [vmem:[%s7055_s11 + $0x18] sm:$0xff]   ;;  %v6799_v56 = vld [vmem:[%s7055_s11 + $0x10] sm:$0xfc]   ;;  %v6807_v39 = vld [vmem:[%s7055_s11 + $0x80] sm:$0xff]  }
  0x88   : > { %v1048_v55 = vsel %vm900_vm4, %v1043_v49, %v1047_v47  ;;  %v1542_v47 = vsel %vm1523_vm5, %v1539_v7, %v1541_v42  ;;  %v6793_v49 = vld [vmem:[%s7055_s11 + $0x90] sm:$0xff]   ;;  %v1544_v60 = vsel %vm1523_vm5, %v1541_v42, %v1543_v51 }
  0x89   : > { %v1530_v8 = vsel %vm1523_vm5, %v1527_v62, %v1529_v1 }
  0x8d   : > { %6059 = vmatmul.mubr.msk.bf16.gmra.mrb[20].mxu1 %vm424_vm1, %v1000_v63  ;;  %6223 = vmatmul.mubr.msk.bf16.gmra.mrb[32].mxu0 %vm424_vm1, %v3228_v10  ;;  %v6779_v63 = vld [vmem:[%s7055_s11 + $0x58] sm:$0xff]   ;;  %v2127_v10 = vsel %vm479_vm0, %v7223_v22, 0  ;;  %v6870_v22 = vld [vmem:[%s7753_s1 + $0x8] sm:$0x3] }
  0x8e   : > { %6062 = vmatprep.mubr.msk.bf16.mxu1 %vm424_vm1, %v1008_v4  ;;  %6228 = vmatprep.mubr.msk.bf16.mxu0 %vm424_vm1, %v3705_v14  ;;  %v1528_v4 = vsel %vm1523_vm5, %v1525_v53, %v1527_v62  ;;  %v3720_v5 = vrot.slane %v6779_v63, 2  ;;  %v3733_v53 = vsel %vm3191_vm3, %v3730_v43, %v3732_v46  ;;  %v4224_v62 = vshrl.u32 %v6800_v52, 16 }
  0x8f   : > { %v4227_v63 = vshll.u32 %v6800_v52, 16 }
  0x90   : > { %v3721_v14 = vsel %vm3191_vm3, %v3718_v2, %v3720_v5  ;;  %v4216_v2 = vshrl.u32 %v6799_v56, 16  ;;  %v4226_v9 = vrot.slane %v4224_v62, 2 }
  0x95   : > { %6063 = vmatmul.mubr.msk.bf16.gmra.mrb[24].mxu1 %vm424_vm1, %v1016_v20  ;;  %6229 = vmatmul.mubr.msk.bf16.vlgmr.msra.gmra.mrb[0].mxu0 %vm424_vm1, %v3707_v30  ;;  %v3724_v20 = vrot.slane %v6783_v15, 2  ;;  %v3726_v30 = vrot.slane %v6785_v25, 2  ;;  %v4245_v25 = vshll.u32 %v6804_v12, 16 }
  0x96   : > { %6066 = vmatprep.mubr.msk.bf16.mxu1 %vm424_vm1, %v1024_v24  ;;  %6265 = vmatpush3.bf16.msra.mxu0 %v4440_v33  ;;  %v3723_v24 = vsel %vm3191_vm3, %v3720_v5, %v3722_v17  ;;  %v3728_v33 = vrot.slane %v6787_v28, 2  ;;  %v1547_v5 = vrot.slane %v6798_v58, 1  ;;  %v6806_v28 = vld [vmem:[%s7055_s11 + $0x30] sm:$0xff]  }
  0x97   : > { %6232 = vmatprep.mubr.msk.bf16.mxu0 %vm424_vm1, %v3709_v34  ;;  %6639 = vmatprep.subr.msk.bf16.mxu0 %vm479_vm0, %v7280_v38  ;;  %v3725_v27 = vsel %vm3191_vm3, %v3722_v17, %v3724_v20  ;;  %v1538_v34 = vsel %vm1523_vm5, %v1535_v26, %v1537_v29  ;;  %v3727_v37 = vsel %vm3191_vm3, %v3724_v20, %v3726_v30  ;;  %v6803_v17 = vld [vmem:[%s7055_s11 + $0x70] sm:$0xff]   ;;  %v4242_v20 = vshrl.u32 %v6804_v12, 16  ;;  %v6805_v26 = vld [vmem:[%s7055_s11 + $0x78] sm:$0xff]  }
  0x98   : > { %v4247_v35 = vrot.slane %v4245_v25, 3  ;;  %v6815_v12 = vld [vmem:[%s7055_s11 + $0x50] sm:$0xff]  }
  0x99   : > { %v4244_v32 = vrot.slane %v4242_v20, 2  ;;  %v4290_v20 = vshll.u32 %v6815_v12, 16 }
  0x9b   : > { %v4248_v45 = vor.u32 %v4247_v35, %v4244_v32  ;;  %v6819_v32 = vld [vmem:[%s7055_s11 + $0x60] sm:$0xff]  }
  0x9d   : > { %6067 = vmatmul.mubr.msk.bf16.gmra.mrb[28].mxu1 %vm424_vm1, %v1032_v57  ;;  %6233 = vmatmul.mubr.msk.bf16.gmra.mrb[4].mxu0 %vm424_vm1, %v3711_v48  ;;  %v3729_v57 = vsel %vm3191_vm3, %v3726_v30, %v3728_v33  ;;  %v6796_v48 = vld [vmem:[%s7055_s11 + $0x58] sm:$0xff]  }
  0x9e   : > { %6070 = vmatprep.mubr.msk.bf16.mxu1 %vm424_vm1, %v1040_v44  ;;  %6236 = vmatprep.mubr.msk.bf16.mxu0 %vm424_vm1, %v3713_v50  ;;  %v1540_v44 = vsel %vm1523_vm5, %v1537_v29, %v1539_v7  ;;  %v3731_v50 = vsel %vm3191_vm3, %v3728_v33, %v3730_v43  ;;  %v6808_v33 = vld [vmem:[%s7055_s11 + $0x38] sm:$0xff]   ;;  %v4251_v7 = vshrl.u32 %v6806_v28, 16 }
  0x9f   : > { %v4260_v43 = vshrl.u32 %v6808_v33, 16 }
  0xa5   : > { %6071 = vmatmul.mubr.msk.bf16.gmra.mrb[32].mxu1 %vm424_vm1, %v1048_v55  ;;  %6237 = vmatmul.mubr.msk.bf16.gmra.mrb[8].mxu0 %vm424_vm1, %v3715_v61  ;;  %v1545_v55 = vrot.slane %v6796_v48, 1  ;;  %v6797_v61 = vld [vmem:[%s7055_s11 + $0xa0] ss:$0 sps:$4 sm:$0x33]   ;;  %v4253_v48 = vrot.slane %v4251_v7, 2 }
  0xa6   : > { %6076 = vmatprep.mubr.msk.bf16.mxu1 %vm424_vm1, %v1526_v59  ;;  %6240 = vmatprep.mubr.msk.bf16.mxu0 %vm424_vm1, %v3717_v0  ;;  %v3734_v59 = vrot.slane %v6793_v49, 2  ;;  %v3736_v0 = vrot.slane %v6795_v54, 2  ;;  %v3738_v16 = vrot.slane %v6797_v61, 2 }
  0xa7   : > { %v1546_v1 = vsel %vm1523_vm5, %v1543_v51, %v1545_v55  ;;  %v6810_v51 = vld [vmem:[%s7055_s11 + $0x40] sm:$0xff]  }
  0xa8   : > { %v3737_v13 = vsel %vm3191_vm3, %v3734_v59, %v3736_v0  ;;  %v3739_v29 = vsel %vm3191_vm3, %v3736_v0, %v3738_v16  ;;  %v4269_v62 = vshrl.u32 %v6810_v51, 16  ;;  %v6811_v0 = vld [vmem:[%s7055_s11 + $0x90] ss:$0 sps:$4 sm:$0x11]  }
  0xad   : > { %6077 = vmatmul.mubr.msk.bf16.vlgmr.msra.gmra.mrb[0].mxu1 %vm424_vm1, %v1528_v4  ;;  %6241 = vmatmul.mubr.msk.bf16.gmra.mrb[12].mxu0 %vm424_vm1, %v3719_v11  ;;  %v4219_v4 = vshll.u32 %v6799_v56, 16  ;;  %v1549_v11 = vrot.slane %v6801_v40, 1 }
  0xae   : > { %6080 = vmatprep.mubr.msk.bf16.mxu1 %vm424_vm1, %v1530_v8  ;;  %6113 = vmatpush3.bf16.msra.mxu1 %v2127_v10  ;;  %v3735_v8 = vsel %vm3191_vm3, %v3732_v46, %v3734_v59  ;;  %v4229_v10 = vrot.slane %v4227_v63, 3  ;;  %v6812_v59 = vld [vmem:[%s7055_s11 + $0x48] sm:$0xff]   ;;  %v4272_v63 = vshll.u32 %v6810_v51, 16 }
  0xaf   : > { %6635 = vmatprep.subr.msk.bf16.mxu1 %vm479_vm0, %v6870_v22  ;;  %6244 = vmatprep.mubr.msk.bf16.mxu0 %vm424_vm1, %v3721_v14  ;;  %v4218_v14 = vrot.slane %v4216_v2, 2  ;;  %v4221_v15 = vrot.slane %v4219_v4, 3  ;;  %v4233_v22 = vshrl.u32 %v6802_v6, 16  ;;  %v4281_v2 = vshll.u32 %v6812_v59, 16  ;;  %v6813_v4 = vld [vmem:[%s7055_s11 + $0x8] sm:$0xfe]  }
  0xb0   : > { %v4230_v23 = vor.u32 %v4229_v10, %v4226_v9  ;;  %v4271_v9 = vrot.slane %v4269_v62, 2  ;;  %v4274_v10 = vrot.slane %v4272_v63, 3  ;;  %v6824_v63 = vld [vmem:[%s7055_s11 + $0x38] sm:$0xff]  }
  0xb1   : > { %v4235_v30 = vrot.slane %v4233_v22, 2  ;;  %v6817_v22 = vld [vmem:[%s7055_s11 + $0x58] sm:$0xff]  }
  0xb2   : > { %v4296_v25 = vshrl.u32 %v6817_v22, 16 }
  0xb5   : > { %6081 = vmatmul.mubr.msk.bf16.gmra.mrb[4].mxu1 %vm424_vm1, %v1532_v18  ;;  %6245 = vmatmul.mubr.msk.bf16.gmra.mrb[16].mxu0 %vm424_vm1, %v3723_v24  ;;  %v1548_v18 = vsel %vm1523_vm5, %v1545_v55, %v1547_v5  ;;  %v1550_v24 = vsel %vm1523_vm5, %v1547_v5, %v1549_v11  ;;  %v4952_v55 = vsel %vm479_vm0, %v7280_v38, 0  ;;  %v6814_v5 = vld [vmem:[%s7055_s11 + $0x10] sm:$0xff]  }
  0xb6   : > { %6084 = vmatprep.mubr.msk.bf16.mxu1 %vm424_vm1, %v1534_v21  ;;  %6248 = vmatprep.mubr.msk.bf16.mxu0 %vm424_vm1, %v3725_v27  ;;  %v4222_v21 = vor.u32 %v4221_v15, %v4218_v14  ;;  %v1551_v27 = vrot.slane %v6803_v17, 1  ;;  %v4283_v14 = vrot.slane %v4281_v2, 3  ;;  %v2035_v15 = vrot.slane %v6813_v4, 1  ;;  %v6826_v2 = vld [vmem:[%s7055_s11 + $0x40] sm:$0xff]  }
  0xb7   : > { %v2036_v16 = vrot.slane %v6814_v5, 1  ;;  %v4275_v17 = vor.u32 %v4274_v10, %v4271_v9  ;;  %v6827_v9 = vld [vmem:[%s7055_s11 + $0x80] sm:$0xff]  }
  0xb8   : > { %v1552_v42 = vsel %vm1523_vm5, %v1549_v11, %v1551_v27  ;;  %v1559_v11 = vrot.slane %v6811_v0, 1 }
  0xbd   : > { %6085 = vmatmul.mubr.msk.bf16.gmra.mrb[8].mxu1 %vm424_vm1, %v1536_v31  ;;  %6249 = vmatmul.mubr.msk.bf16.gmra.mrb[20].mxu0 %vm424_vm1, %v3727_v37  ;;  %v4238_v31 = vrot.slane %v4236_v19, 3  ;;  %v1553_v37 = vrot.slane %v6805_v26, 1  ;;  %v4287_v19 = vshrl.u32 %v6815_v12, 16  ;;  %v4299_v26 = vshll.u32 %v6817_v22, 16 }
  0xbe   : > { %6088 = vmatprep.mubr.msk.bf16.mxu1 %vm424_vm1, %v1538_v34  ;;  %6252 = vmatprep.mubr.msk.bf16.mxu0 %vm424_vm1, %v3729_v57  ;;  %v4231_v34 = vsel %vm4214_vm6, %v4222_v21, %v4230_v23  ;;  %v4254_v57 = vshll.u32 %v6806_v28, 16  ;;  %v6816_v21 = vld [vmem:[%s7055_s11 + $0x18] sm:$0xff]   ;;  %v4341_v22 = vshrl.u32 %v6827_v9, 16 }
  0xbf   : > { %v4239_v41 = vor.u32 %v4238_v31, %v4235_v30  ;;  %v1554_v46 = vsel %vm1523_vm5, %v1551_v27, %v1553_v37  ;;  %v6818_v27 = vld [vmem:[%s7055_s11 + $0x20] sm:$0xff]   ;;  %v4292_v30 = vrot.slane %v4290_v20, 3  ;;  %v2038_v31 = vrot.slane %v6816_v21, 1 }
  0xc0   : > { %v4256_v49 = vrot.slane %v4254_v57, 3  ;;  %v4301_v35 = vrot.slane %v4299_v26, 3  ;;  %v4343_v26 = vrot.slane %v4341_v22, 2 }
  0xc1   : > { %v4240_v52 = vsel %vm4214_vm6, %v4230_v23, %v4239_v41  ;;  %v4249_v56 = vsel %vm4214_vm6, %v4239_v41, %v4248_v45  ;;  %v2039_v57 = vsel %vm1523_vm5, %v2036_v16, %v2038_v31  ;;  %v4305_v41 = vshrl.u32 %v6819_v32, 16 }
  0xc2   : > { %v4257_v40 = vor.u32 %v4256_v49, %v4253_v48  ;;  %v6822_v48 = vld [vmem:[%s7055_s11 + $0x30] sm:$0xff]  }
  0xc4   : > { %v4258_v6 = vsel %vm4214_vm6, %v4248_v45, %v4257_v40 }
  0xc5   : > { %6089 = vmatmul.mubr.msk.bf16.gmra.mrb[12].mxu1 %vm424_vm1, %v1540_v44  ;;  %6253 = vmatmul.mubr.msk.bf16.gmra.mrb[24].mxu0 %vm424_vm1, %v3731_v50  ;;  %v4263_v44 = vshll.u32 %v6808_v33, 16  ;;  %v1555_v50 = vrot.slane %v6807_v39, 1  ;;  %v6821_v39 = vld [vmem:[%s7055_s11 + $0x68] sm:$0xff]  }
  0xc6   : > { %6092 = vmatprep.mubr.msk.bf16.mxu1 %vm424_vm1, %v1542_v47  ;;  %6256 = vmatprep.mubr.msk.bf16.mxu0 %vm424_vm1, %v3733_v53  ;;  %v6809_v47 = vld [vmem:[%s7055_s11 + $0x88] sm:$0xff]   ;;  %v4262_v53 = vrot.slane %v4260_v43, 2 }
  0xc7   : > { %v4265_v54 = vrot.slane %v4263_v44, 3  ;;  %v1557_v58 = vrot.slane %v6809_v47, 1  ;;  %v6820_v43 = vld [vmem:[%s7055_s11 + $0x28] sm:$0xff]   ;;  %v4317_v47 = vshll.u32 %v6821_v39, 16 }
  0xc9   : > { %v4266_v61 = vor.u32 %v4265_v54, %v4262_v53  ;;  %v1558_v38 = vsel %vm1523_vm5, %v1555_v50, %v1557_v58  ;;  %v6823_v53 = vld [vmem:[%s7055_s11 + $0x70] sm:$0xff]  }
  0xca   : > { %v4326_v62 = vshll.u32 %v6823_v53, 16 }
  0xcb   : > { %v4276_v28 = vsel %vm4214_vm6, %v4266_v61, %v4275_v17 }
  0xcd   : > { %6093 = vmatmul.mubr.msk.bf16.gmra.mrb[16].mxu1 %vm424_vm1, %v1544_v60  ;;  %6257 = vmatmul.mubr.msk.bf16.gmra.mrb[28].mxu0 %vm424_vm1, %v3735_v8  ;;  %v1556_v60 = vsel %vm1523_vm5, %v1553_v37, %v1555_v50  ;;  %v4267_v8 = vsel %vm4214_vm6, %v4257_v40, %v4266_v61  ;;  %v2040_v37 = vrot.slane %v6818_v27, 1  ;;  %v4307_v50 = vrot.slane %v4305_v41, 2 }
  0xce   : > { %6096 = vmatprep.mubr.msk.bf16.mxu1 %vm424_vm1, %v1546_v1  ;;  %6260 = vmatprep.mubr.msk.bf16.mxu0 %vm424_vm1, %v3737_v13  ;;  %v4278_v1 = vshrl.u32 %v6812_v59, 16  ;;  %v6825_v59 = vld [vmem:[%s7055_s11 + $0x78] sm:$0xff]   ;;  %v4323_v61 = vshrl.u32 %v6823_v53, 16 }
  0xcf   : > { %v2041_v45 = vsel %vm1523_vm5, %v2038_v31, %v2040_v37 }
  0xd0   : > { %v4280_v13 = vrot.slane %v4278_v1, 2  ;;  %v4335_v1 = vshll.u32 %v6825_v59, 16  ;;  %v4325_v5 = vrot.slane %v4323_v61, 2 }
  0xd2   : > { %v4284_v23 = vor.u32 %v4283_v14, %v4280_v13  ;;  %v4337_v12 = vrot.slane %v4335_v1, 3  ;;  %v2048_v13 = vrot.slane %v6826_v2, 1  ;;  %v6829_v14 = vld [vmem:[%s7055_s11 + $0x88] sm:$0xff]   ;;  %v6837_v2 = vld [vmem:[%s7055_s11 + $0x10] sm:$0xf8]  }
  0xd3   : > { %v4350_v21 = vshrl.u32 %v6829_v14, 16 }
  0xd4   : > { %v4285_v33 = vsel %vm4214_vm6, %v4275_v17, %v4284_v23  ;;  %v4344_v17 = vshll.u32 %v6827_v9, 16  ;;  %v6841_v9 = vld [vmem:[%s7055_s11 + $0x78] sm:$0xff]  }
  0xd5   : > { %6097 = vmatmul.mubr.msk.bf16.gmra.mrb[20].mxu1 %vm424_vm1, %v1548_v18  ;;  %6261 = vmatmul.mubr.msk.bf16.gmra.mrb[32].mxu0 %vm424_vm1, %v3739_v29  ;;  %v1560_v18 = vsel %vm1523_vm5, %v1557_v58, %v1559_v11  ;;  %v4289_v29 = vrot.slane %v4287_v19, 2  ;;  %v2044_v58 = vrot.slane %v6822_v48, 1  ;;  %v4352_v31 = vrot.slane %v4350_v21, 2  ;;  %v6845_v21 = vld [vmem:[%s7055_s11 + $0x88] sm:$0xff]  }
  0xd6   : > { %6100 = vmatprep.mubr.msk.bf16.mxu1 %vm424_vm1, %v1550_v24  ;;  %6266 = vmatprep.mubr.msk.bf16.mxu0 %vm424_vm1, %v4231_v34  ;;  %v2037_v24 = vsel %vm1523_vm5, %v2035_v15, %v2036_v16  ;;  %v4298_v34 = vrot.slane %v4296_v25, 2  ;;  %v4346_v27 = vrot.slane %v4344_v17, 3  ;;  %v6842_v17 = vld [vmem:[%s7055_s11 + $0x28] sm:$0xff]  }
  0xd7   : > { %v4293_v7 = vor.u32 %v4292_v30, %v4289_v29  ;;  %v6831_v29 = vld [vmem:[%s7055_s11 + $0x90] sm:$0xff]  }
  0xd8   : > { %v4302_v44 = vor.u32 %v4301_v35, %v4298_v34  ;;  %v6833_v34 = vld [vmem:[%s7055_s11 + $0x98] sm:$0xff]   ;;  %v4347_v35 = vor.u32 %v4346_v27, %v4343_v26  ;;  %v6851_v26 = vld [vmem:[%s7055_s11 + $0x60] sm:$0xff]  }
  0xd9   : > { %v4294_v49 = vsel %vm4214_vm6, %v4284_v23, %v4293_v7  ;;  %v4353_v23 = vshll.u32 %v6829_v14, 16 }
  0xda   : > { %v4303_v54 = vsel %vm4214_vm6, %v4293_v7, %v4302_v44  ;;  %v4362_v7 = vshll.u32 %v6831_v29, 16 }
  0xdc   : > { %v4364_v48 = vrot.slane %v4362_v7, 3  ;;  %v6853_v7 = vld [vmem:[%s7055_s11 + $0x68] sm:$0xff]  }
  0xdd   : > { %6101 = vmatmul.mubr.msk.bf16.gmra.mrb[24].mxu1 %vm424_vm1, %v1552_v42  ;;  %6267 = vmatmul.mubr.msk.bf16.vlgmr.msra.gmra.mrb[0].mxu0 %vm424_vm1, %v4240_v52  ;;  %v4308_v42 = vshll.u32 %v6819_v32, 16  ;;  %v2042_v52 = vrot.slane %v6820_v43, 1  ;;  %v4355_v32 = vrot.slane %v4353_v23, 3  ;;  %v4368_v43 = vshrl.u32 %v6833_v34, 16 }
  0xde   : > { %6104 = vmatprep.mubr.msk.bf16.mxu1 %vm424_vm1, %v1554_v46  ;;  %6303 = vmatpush3.bf16.msra.mxu0 %v4952_v55  ;;  %v4314_v46 = vshrl.u32 %v6821_v39, 16  ;;  %v4359_v39 = vshrl.u32 %v6831_v29, 16  ;;  %v4865_v23 = vrot.slane %v6842_v17, 3  ;;  %v2066_v29 = vrot.slane %v6845_v21, 1 }
  0xdf   : > { %6270 = vmatprep.mubr.msk.bf16.mxu0 %vm424_vm1, %v4249_v56  ;;  %v4310_v51 = vrot.slane %v4308_v42, 3  ;;  %v4319_v56 = vrot.slane %v4317_v47, 3  ;;  %v2045_v0 = vsel %vm1523_vm5, %v2042_v52, %v2044_v58  ;;  %v4356_v41 = vor.u32 %v4355_v32, %v4352_v31  ;;  %v6846_v31 = vld [vmem:[%s7055_s11 + $0x38] sm:$0xff]  }
  0xe0   : > { %v4316_v55 = vrot.slane %v4314_v46, 2  ;;  %v4361_v47 = vrot.slane %v4359_v39, 2  ;;  %v6849_v39 = vld [vmem:[%s7055_s11 + $0x98] ss:$0 sps:$4 sm:$0x11]  }
  0xe1   : > { %v4311_v40 = vor.u32 %v4310_v51, %v4307_v50  ;;  %v6835_v50 = vld [vmem:[%s7055_s11 + $0xa0] ss:$0 sps:$4 sm:$0x77]   ;;  %v4357_v51 = vsel %vm4214_vm6, %v4347_v35, %v4356_v41 }
  0xe3   : > { %v4312_v4 = vsel %vm4214_vm6, %v4302_v44, %v4311_v40  ;;  %v4371_v44 = vshll.u32 %v6833_v34, 16  ;;  %v2649_v34 = vshll.u32 %v6851_v26, 16 }
  0xe5   : > { %6105 = vmatmul.mubr.msk.bf16.gmra.mrb[28].mxu1 %vm424_vm1, %v1556_v60  ;;  %6271 = vmatmul.mubr.msk.bf16.gmra.mrb[4].mxu0 %vm424_vm1, %v4258_v6  ;;  %v2043_v60 = vsel %vm1523_vm5, %v2040_v37, %v2042_v52  ;;  %v4328_v6 = vrot.slane %v4326_v62, 3  ;;  %v4370_v52 = vrot.slane %v4368_v43, 2  ;;  %v4373_v53 = vrot.slane %v4371_v44, 3  ;;  %v6839_v62 = vld [vmem:[%s7055_s11 + $0x70] sm:$0xff]  }
  0xe6   : > { %6108 = vmatprep.mubr.msk.bf16.mxu1 %vm424_vm1, %v1558_v38  ;;  %6274 = vmatprep.mubr.msk.bf16.mxu0 %vm424_vm1, %v4267_v8  ;;  %v4332_v38 = vshrl.u32 %v6825_v59, 16  ;;  %v2046_v8 = vrot.slane %v6824_v63, 1  ;;  %v4380_v59 = vshll.u32 %v6835_v50, 16  ;;  %v2651_v43 = vrot.slane %v2649_v34, 2  ;;  %v6855_v44 = vld [vmem:[%s7055_s11 + $0x70] sm:$0xff]  }
  0xe7   : > { %v4329_v15 = vor.u32 %v4328_v6, %v4325_v5  ;;  %v2060_v5 = vrot.slane %v6839_v62, 1  ;;  %v6865_v34 = vld [vmem:[%s7055_s11 + $0x98] ss:$0 sps:$4 sm:$0x33]  }
  0xe8   : > { %v4334_v11 = vrot.slane %v4332_v38, 2  ;;  %v2047_v16 = vsel %vm1523_vm5, %v2044_v58, %v2046_v8  ;;  %v2049_v20 = vsel %vm1523_vm5, %v2046_v8, %v2048_v13  ;;  %v4377_v58 = vshrl.u32 %v6835_v50, 16 }
  0xea   : > { %v4338_v19 = vor.u32 %v4337_v12, %v4334_v11 }
  0xec   : > { %v4339_v30 = vsel %vm4214_vm6, %v4329_v15, %v4338_v19  ;;  %v4348_v46 = vsel %vm4214_vm6, %v4338_v19, %v4347_v35 }
  0xed   : > { %6109 = vmatmul.mubr.msk.bf16.gmra.mrb[32].mxu1 %vm424_vm1, %v1560_v18  ;;  %6275 = vmatmul.mubr.msk.bf16.gmra.mrb[8].mxu0 %vm424_vm1, %v4276_v28  ;;  %v6828_v18 = vld [vmem:[%s7055_s11 + $0x48] sm:$0xff]  }
  0xee   : > { %6114 = vmatprep.mubr.msk.bf16.mxu1 %vm424_vm1, %v2037_v24  ;;  %6278 = vmatprep.mubr.msk.bf16.mxu0 %vm424_vm1, %v4285_v33  ;;  %v6830_v24 = vld [vmem:[%s7055_s11 + $0x50] sm:$0xff]   ;;  %v2050_v28 = vrot.slane %v6828_v18, 1 }
  0xef   : > { %v2052_v33 = vrot.slane %v6830_v24, 1 }
  0xf0   : > { %v2051_v37 = vsel %vm1523_vm5, %v2048_v13, %v2050_v28  ;;  %v6843_v13 = vld [vmem:[%s7055_s11 + $0x80] sm:$0xff]  }
  0xf1   : > { %v2053_v42 = vsel %vm1523_vm5, %v2050_v28, %v2052_v33  ;;  %v2064_v18 = vrot.slane %v6843_v13, 1  ;;  %v6844_v28 = vld [vmem:[%s7055_s11 + $0x30] sm:$0xff]  }
  0xf2   : > { %v4867_v35 = vrot.slane %v6844_v28, 3 }
  0xf5   : > { %6115 = vmatmul.mubr.msk.bf16.vlgmr.msra.gmra.mrb[0].mxu1 %vm424_vm1, %v2039_v57  ;;  %6279 = vmatmul.mubr.msk.bf16.gmra.mrb[12].mxu0 %vm424_vm1, %v4294_v49  ;;  %v6832_v57 = vld [vmem:[%s7055_s11 + $0x58] sm:$0xff]  }
  0xf6   : > { %6118 = vmatprep.mubr.msk.bf16.mxu1 %vm424_vm1, %v2041_v45  ;;  %6341 = vmatpush3.bf16.msra.mxu1 %v7041_v3  ;;  %v4320_v3 = vor.u32 %v4319_v56, %v4316_v55  ;;  %v6834_v45 = vld [vmem:[%s7055_s11 + $0x60] sm:$0xff]   ;;  %v2054_v49 = vrot.slane %v6832_v57, 1  ;;  %v4365_v55 = vor.u32 %v4364_v48, %v4361_v47  ;;  %v4869_v57 = vrot.slane %v6846_v31, 3 }
  0xf7   : > { %6282 = vmatprep.mubr.msk.bf16.mxu0 %vm424_vm1, %v4303_v54  ;;  %v2056_v54 = vrot.slane %v6834_v45, 1  ;;  %v4868_v45 = vsel %vm4859_vm7, %v4865_v23, %v4867_v35  ;;  %v2070_v47 = vrot.slane %v6849_v39, 1  ;;  %v2655_v48 = vshrl.u32 %v6853_v7, 16 }
  0xf8   : > { %v4321_v10 = vsel %vm4214_vm6, %v4311_v40, %v4320_v3  ;;  %v4330_v25 = vsel %vm4214_vm6, %v4320_v3, %v4329_v15  ;;  %v2055_v56 = vsel %vm1523_vm5, %v2052_v33, %v2054_v49  ;;  %v6836_v40 = vld [vmem:[%s7055_s11 + $0x68] sm:$0xff]   ;;  %v4366_v63 = vsel %vm4214_vm6, %v4356_v41, %v4365_v55  ;;  %v6840_v15 = vld [vmem:[%s7055_s11 + $0x20] sm:$0xff]  }
  0xf9   : > { %v2057_v61 = vsel %vm1523_vm5, %v2054_v49, %v2056_v54  ;;  %v4379_v3 = vrot.slane %v4377_v58, 2  ;;  %v2058_v38 = vrot.slane %v6836_v40, 1  ;;  %v4863_v19 = vrot.slane %v6840_v15, 3  ;;  %v6857_v40 = vld [vmem:[%s7055_s11 + $0x78] sm:$0xff]  }
  0xfa   : > { %v2646_v33 = vshrl.u32 %v6851_v26, 16  ;;  %v2658_v49 = vshll.u32 %v6853_v7, 16  ;;  %v4870_v50 = vsel %vm4859_vm7, %v4867_v35, %v4869_v57  ;;  %v2657_v58 = vrot.slane %v2655_v48, 1  ;;  %v6858_v26 = vld [vmem:[%s7055_s11 + $0x68] sm:$0xff]  }
  0xfb   : > { %v2059_v8 = vsel %vm1523_vm5, %v2056_v54, %v2058_v38  ;;  %v2061_v12 = vsel %vm1523_vm5, %v2058_v38, %v2060_v5  ;;  %v2667_v54 = vshll.u32 %v6855_v44, 16  ;;  %v6852_v38 = vld [vmem:[%s7055_s11 + $0x50] sm:$0xff]   ;;  %v4881_v35 = vrot.slane %v6858_v26, 3 }
  0xfd   : > { %6119 = vmatmul.mubr.msk.bf16.gmra.mrb[4].mxu1 %vm424_vm1, %v2043_v60  ;;  %6283 = vmatmul.mubr.msk.bf16.gmra.mrb[16].mxu0 %vm424_vm1, %v4312_v4  ;;  %v4374_v60 = vor.u32 %v4373_v53, %v4370_v52  ;;  %v6838_v4 = vld [vmem:[%s7055_s11 + $0x18] sm:$0xff]   ;;  %v2664_v53 = vshrl.u32 %v6855_v44, 16  ;;  %v2712_v44 = vshll.u32 %v6865_v34, 16 }
  0xfe   : > { %6122 = vmatprep.mubr.msk.bf16.mxu1 %vm424_vm1, %v2045_v0  ;;  %6286 = vmatprep.mubr.msk.bf16.mxu0 %vm424_vm1, %v4321_v10  ;;  %v4382_v0 = vrot.slane %v4380_v59, 3  ;;  %v4860_v10 = vrot.slane %v6837_v2, 3  ;;  %v4861_v11 = vrot.slane %v6838_v4, 3  ;;  %v2660_v59 = vrot.slane %v2658_v49, 2 }
  0xff   : > { %v4375_v1 = vsel %vm4214_vm6, %v4365_v55, %v4374_v60  ;;  %v2666_v62 = vrot.slane %v2664_v53, 1  ;;  %v2673_v2 = vshrl.u32 %v6857_v40, 16  ;;  %v2676_v4 = vshll.u32 %v6857_v40, 16 }
 0x100   : > { %v4383_v6 = vor.u32 %v4382_v0, %v4379_v3  ;;  %v4862_v22 = vsel %vm4859_vm7, %v4860_v10, %v4861_v11  ;;  %v4864_v27 = vsel %vm4859_vm7, %v4861_v11, %v4863_v19  ;;  %v6859_v3 = vld [vmem:[%s7055_s11 + $0x80] sm:$0xff]   ;;  %v4875_v10 = vrot.slane %v6852_v38, 3 }
 0x101   : > { %v2678_v13 = vrot.slane %v2676_v4, 2  ;;  %v6869_v4 = vld [vmem:[%s7055_s11 + $0xa0] ss:$0 sps:$4 sm:$0x77]  }
 0x102   : > { %v4384_v14 = vsel %vm4214_vm6, %v4374_v60, %v4383_v6  ;;  %v6854_v6 = vld [vmem:[%s7055_s11 + $0x58] sm:$0xff]  }
 0x103   : > { %v4877_v15 = vrot.slane %v6854_v6, 3  ;;  %v4895_v6 = vrot.slane %v6869_v4, 3 }
 0x105   : > { %6123 = vmatmul.mubr.msk.bf16.gmra.mrb[8].mxu1 %vm424_vm1, %v2047_v16  ;;  %6287 = vmatmul.mubr.msk.bf16.gmra.mrb[20].mxu0 %vm424_vm1, %v4330_v25  ;;  %v2062_v16 = vrot.slane %v6841_v9, 1  ;;  %v6847_v25 = vld [vmem:[%s7055_s11 + $0x90] sm:$0xff]   ;;  %v2685_v9 = vshll.u32 %v6859_v3, 16 }
 0x106   : > { %6126 = vmatprep.mubr.msk.bf16.mxu1 %vm424_vm1, %v2049_v20  ;;  %6290 = vmatprep.mubr.msk.bf16.mxu0 %vm424_vm1, %v4339_v30  ;;  %v4866_v30 = vsel %vm4859_vm7, %v4863_v19, %v4865_v23  ;;  %v2068_v32 = vrot.slane %v6847_v25, 1  ;;  %v4878_v25 = vsel %vm4859_vm7, %v4875_v10, %v4877_v15 }
 0x107   : > { %v2063_v20 = vsel %vm1523_vm5, %v2060_v5, %v2062_v16  ;;  %v2065_v24 = vsel %vm1523_vm5, %v2062_v16, %v2064_v18  ;;  %v2687_v17 = vrot.slane %v2685_v9, 2 }
 0x108   : > { %v2069_v41 = vsel %vm1523_vm5, %v2066_v29, %v2068_v32 }
 0x10d   : > { %6127 = vmatmul.mubr.msk.bf16.gmra.mrb[12].mxu1 %vm424_vm1, %v2051_v37  ;;  %6291 = vmatmul.mubr.msk.bf16.gmra.mrb[24].mxu0 %vm424_vm1, %v4348_v46  ;;  %v2067_v37 = vsel %vm1523_vm5, %v2064_v18, %v2066_v29  ;;  %v6848_v46 = vld [vmem:[%s7055_s11 + $0x40] sm:$0xff]   ;;  %v6863_v18 = vld [vmem:[%s7055_s11 + $0x90] sm:$0xff]  }
 0x10e   : > { %6130 = vmatprep.mubr.msk.bf16.mxu1 %vm424_vm1, %v2053_v42  ;;  %6294 = vmatprep.mubr.msk.bf16.mxu0 %vm424_vm1, %v4357_v51  ;;  %v2648_v42 = vrot.slane %v2646_v33, 1  ;;  %v6850_v51 = vld [vmem:[%s7055_s11 + $0x48] sm:$0xff]   ;;  %v4871_v55 = vrot.slane %v6848_v46, 3  ;;  %v2700_v28 = vshrl.u32 %v6863_v18, 16  ;;  %v2703_v29 = vshll.u32 %v6863_v18, 16  ;;  %v6862_v46 = vld [vmem:[%s7055_s11 + $0x78] sm:$0xff]  }
 0x10f   : > { %v4873_v60 = vrot.slane %v6850_v51, 3  ;;  %v2714_v51 = vrot.slane %v2712_v44, 2 }
 0x110   : > { %v2652_v52 = vor.u32 %v2651_v43, %v2648_v42  ;;  %v4872_v0 = vsel %vm4859_vm7, %v4869_v57, %v4871_v55  ;;  %v2702_v39 = vrot.slane %v2700_v28, 1  ;;  %v2705_v7 = vrot.slane %v2703_v29, 2  ;;  %v7611_v29 = vld [vmem:[%s7754_s2] ss:$0 sm:$0xff] }
 0x111   : > { %v4874_v5 = vsel %vm4859_vm7, %v4871_v55, %v4873_v60  ;;  %v4876_v19 = vsel %vm4859_vm7, %v4873_v60, %v4875_v10  ;;  %v2709_v43 = vshrl.u32 %v6865_v34, 16  ;;  %v6864_v55 = vld [vmem:[%s7055_s11 + $0x80] sm:$0xff]  }
 0x112   : > { %v4887_v40 = vrot.slane %v6864_v55, 3 }
 0x115   : > { %6131 = vmatmul.mubr.msk.bf16.gmra.mrb[16].mxu1 %vm424_vm1, %v2055_v56  ;;  %6295 = vmatmul.mubr.msk.bf16.gmra.mrb[28].mxu0 %vm424_vm1, %v4366_v63  ;;  %v2071_v56 = vsel %vm1523_vm5, %v2068_v32, %v2070_v47  ;;  %v2669_v63 = vrot.slane %v2667_v54, 2  ;;  %v2706_v47 = vor.u32 %v2705_v7, %v2702_v39 }
 0x116   : > { %6134 = vmatprep.mubr.msk.bf16.mxu1 %vm424_vm1, %v2057_v61  ;;  %6298 = vmatprep.mubr.msk.bf16.mxu0 %vm424_vm1, %v4375_v1  ;;  %v2653_v61 = vsel %vm2546_vm2, %v7127_v36, %v2652_v52  ;;  %v2661_v1 = vor.u32 %v2660_v59, %v2657_v58  ;;  %v2682_v36 = vshrl.u32 %v6859_v3, 16  ;;  %v6866_v59 = vld [vmem:[%s7055_s11 + $0x88] sm:$0xff]  }
 0x118   : > { %v2662_v11 = vsel %vm2546_vm2, %v2652_v52, %v2661_v1  ;;  %v4885_v52 = vrot.slane %v6862_v46, 3 }
 0x11d   : > { %6135 = vmatmul.mubr.msk.bf16.gmra.mrb[20].mxu1 %vm424_vm1, %v2059_v8  ;;  %6299 = vmatmul.mubr.msk.bf16.gmra.mrb[32].mxu0 %vm424_vm1, %v4384_v14  ;;  %v2670_v8 = vor.u32 %v2669_v63, %v2666_v62  ;;  %v6861_v14 = vld [vmem:[%s7055_s11 + $0x88] sm:$0xff]   ;;  %v4888_v62 = vsel %vm4859_vm7, %v4885_v52, %v4887_v40  ;;  %v6867_v63 = vld [vmem:[%s7055_s11 + $0x90] sm:$0xff]  }
 0x11e   : > { %6138 = vmatprep.mubr.msk.bf16.mxu1 %vm424_vm1, %v2061_v12  ;;  %6304 = vmatprep.mubr.msk.bf16.mxu0 %vm424_vm1, %v4862_v22  ;;  %v2675_v12 = vrot.slane %v2673_v2, 1  ;;  %v2684_v22 = vrot.slane %v2682_v36, 1  ;;  %v2691_v23 = vshrl.u32 %v6861_v14, 16  ;;  %v4891_v38 = vrot.slane %v6867_v63, 3 }
 0x11f   : > { %v2671_v16 = vsel %vm2546_vm2, %v2661_v1, %v2670_v8 }
 0x120   : > { %v2679_v21 = vor.u32 %v2678_v13, %v2675_v12  ;;  %v2693_v32 = vrot.slane %v2691_v23, 1 }
 0x122   : > { %v2680_v31 = vsel %vm2546_vm2, %v2670_v8, %v2679_v21 }
 0x125   : > { %6139 = vmatmul.mubr.msk.bf16.gmra.mrb[24].mxu1 %vm424_vm1, %v2063_v20  ;;  %6305 = vmatmul.mubr.msk.bf16.vlgmr.msra.gmra.mrb[0].mxu0 %vm424_vm1, %v4864_v27  ;;  %v6856_v20 = vld [vmem:[%s7055_s11 + $0x60] sm:$0xff]   ;;  %v2688_v27 = vor.u32 %v2687_v17, %v2684_v22 }
 0x126   : > { %6142 = vmatprep.mubr.msk.bf16.mxu1 %vm424_vm1, %v2065_v24  ;;  %6308 = vmatprep.mubr.msk.bf16.mxu0 %vm424_vm1, %v4866_v30  ;;  %v2694_v24 = vshll.u32 %v6861_v14, 16  ;;  %v4879_v30 = vrot.slane %v6856_v20, 3 }
 0x128   : > { %v2696_v33 = vrot.slane %v2694_v24, 2  ;;  %v4880_v57 = vsel %vm4859_vm7, %v4877_v15, %v4879_v30 }
 0x12a   : > { %v2697_v42 = vor.u32 %v2696_v33, %v2693_v32 }
 0x12c   : > { %v2698_v49 = vsel %vm2546_vm2, %v2688_v27, %v2697_v42  ;;  %v2707_v53 = vsel %vm2546_vm2, %v2697_v42, %v2706_v47 }
 0x12d   : > { %6143 = vmatmul.mubr.msk.bf16.gmra.mrb[28].mxu1 %vm424_vm1, %v2067_v37  ;;  %6309 = vmatmul.mubr.msk.bf16.gmra.mrb[4].mxu0 %vm424_vm1, %v4868_v45  ;;  %v2689_v37 = vsel %vm2546_vm2, %v2679_v21, %v2688_v27  ;;  %v4882_v45 = vsel %vm4859_vm7, %v4879_v30, %v4881_v35 }
 0x12e   : > { %6146 = vmatprep.mubr.msk.bf16.mxu1 %vm424_vm1, %v2069_v41  ;;  %6312 = vmatprep.mubr.msk.bf16.mxu0 %vm424_vm1, %v4870_v50  ;;  %v6860_v41 = vld [vmem:[%s7055_s11 + $0x70] sm:$0xff]   ;;  %v2711_v50 = vrot.slane %v2709_v43, 1 }
 0x12f   : > { %v4883_v48 = vrot.slane %v6860_v41, 3 }
 0x131   : > { %v4884_v54 = vsel %vm4859_vm7, %v4881_v35, %v4883_v48  ;;  %v4886_v58 = vsel %vm4859_vm7, %v4883_v48, %v4885_v52 }
 0x135   : > { %6147 = vmatmul.mubr.msk.bf16.gmra.mrb[32].mxu1 %vm424_vm1, %v2071_v56  ;;  %6313 = vmatmul.mubr.msk.bf16.gmra.mrb[8].mxu0 %vm424_vm1, %v4872_v0  ;;  %v2715_v56 = vor.u32 %v2714_v51, %v2711_v50  ;;  %v6868_v0 = vld [vmem:[%s7055_s11 + $0x98] sm:$0xff]   ;;  %s7617_s11 = scalar_lea.vmem [#allocation3], %s6640_s8 }
 0x136   : > { %6172 = vmatprep.mubr.msk.bf16.mxu1 %vm424_vm1, %v2653_v61  ;;  %6316 = vmatprep.mubr.msk.bf16.mxu0 %vm424_vm1, %v4874_v5  ;;  %v4889_v61 = vrot.slane %v6866_v59, 3  ;;  %v4893_v1 = vrot.slane %v6868_v0, 3  ;;  %s5371_s19 = sshll.u32 %s7617_s11, 4  ;;  %s7699_s19 = int_to_ptr.vmem [resolvable:$true] %s5371_s19 }
 0x137   : > { %v2716_v60 = vsel %vm2546_vm2, %v2706_v47, %v2715_v56  ;;  %s6871_s27 = scalar_lea.vmem %s7699_s19, 4608  ;;  %p6878_p1 = scmp.lt.s32.totalorder %s7699_s19, %s6876_s29 }
 0x138   : > { %v4890_v3 = vsel %vm4859_vm7, %v4887_v40, %v4889_v61  ;;  %v4892_v2 = vsel %vm4859_vm7, %v4889_v61, %v4891_v38  ;;  %v4894_v5 = vsel %vm4859_vm7, %v4891_v38, %v4893_v1  ;;  %v4896_v8 = vsel %vm4859_vm7, %v4893_v1, %v4895_v6  ;;  %p6872_p12 = scmp.ne.s32.totalorder %s7699_s19, %s6871_s27  ;;  %p6879_p2 = scmp.lt.s32.totalorder %s6877_s30, %s6871_s27 }
 0x13a   : > { %p6873_p13 = pnand %p6872_p12, %p7014_p4  ;;  %p6880_p3 = por %p6879_p2, %p6878_p1 }
 0x13c   : > { %p6874_p0 = pneg %p6873_p13 }
 0x13d   : > { %6173 = vmatmul.mubr.msk.bf16.vlgmr.msra.gmra.mrb[20].mxu1 %vm424_vm1, %v2662_v11  ;;  %6317 = vmatmul.mubr.msk.bf16.gmra.mrb[12].mxu0 %vm424_vm1, %v4876_v19 }
 0x13e   : > { %6176 = vmatprep.mubr.msk.bf16.mxu1 %vm424_vm1, %v2671_v16  ;;  %6320 = vmatprep.mubr.msk.bf16.mxu0 %vm424_vm1, %v4878_v25  ;;  %p6881_p5 = pnand %p6880_p3, %p6874_p0 }
 0x145   : > { %6177 = vmatmul.mubr.msk.bf16.gmra.mrb[24].mxu1 %vm424_vm1, %v2680_v31  ;;  %6321 = vmatmul.mubr.msk.bf16.gmra.mrb[16].mxu0 %vm424_vm1, %v4880_v57 }
 0x146   : > { %6180 = vmatprep.mubr.msk.bf16.mxu1 %vm424_vm1, %v2689_v37  ;;  %6324 = vmatprep.mubr.msk.bf16.mxu0 %vm424_vm1, %v4882_v45 }
 0x14d   : > { %6181 = vmatmul.mubr.msk.bf16.gmra.mrb[28].mxu1 %vm424_vm1, %v2698_v49  ;;  %6325 = vmatmul.mubr.msk.bf16.gmra.mrb[20].mxu0 %vm424_vm1, %v4884_v54 }
 0x14e   : > { %6184 = vmatprep.mubr.msk.bf16.mxu1 %vm424_vm1, %v2707_v53  ;;  %6328 = vmatprep.mubr.msk.bf16.mxu0 %vm424_vm1, %v4886_v58 }
 0x155   : > { %6185 = vmatmul.mubr.msk.bf16.gmra.mrb[32].mxu1 %vm424_vm1, %v2716_v60  ;;  %6329 = vmatmul.mubr.msk.bf16.gmra.mrb[24].mxu0 %vm424_vm1, %v4888_v62 }
 0x156   : > { %6332 = vmatprep.mubr.msk.bf16.mxu0 %vm424_vm1, %v4890_v3 }
 0x15d   : > { %6333 = vmatmul.mubr.msk.bf16.gmra.mrb[28].mxu0 %vm424_vm1, %v4892_v2 }
 0x15e   : > { %6336 = vmatprep.mubr.msk.bf16.mxu0 %vm424_vm1, %v4894_v5 }
 0x165   : > { %6337 = vmatmul.mubr.msk.bf16.gmra.mrb[32].mxu0 %vm424_vm1, %v4896_v8 }
 0x1c8   : > { %v6116_v36 = vpop.f32.mrb[0].mxu1 }
 0x1c9   : > { %v2163_v9 = vpop.f32.mrb[1].mxu1 }
 0x1ca   : > { %v6117_v10 = vpop.f32.mrb[2].mxu1 }
 0x1cb   : > { %v2166_v11 = vpop.f32.mrb[3].mxu1 }
 0x1d0   : > { %v6120_v12 = vpop.f32.mrb[4].mxu1 }
 0x1d1   : > { %v2179_v13 = vpop.f32.mrb[5].mxu1 }
 0x1d2   : > { %v6121_v14 = vpop.f32.mrb[6].mxu1 }
 0x1d3   : > { %v2182_v15 = vpop.f32.mrb[7].mxu1 }
 0x1d8   : > { %v6124_v16 = vpop.f32.mrb[8].mxu1 }
 0x1d9   : > { %v2195_v22 = vpop.f32.mrb[9].mxu1 }
 0x1da   : > { %v6125_v17 = vpop.f32.mrb[10].mxu1 }
 0x1db   : > { %v2198_v18 = vpop.f32.mrb[11].mxu1 }
 0x1e0   : > { %v7589_v19 = vpop.f32.mrb[12].mxu1 }
 0x1e1   : > { %v7591_v20 = vpop.f32.mrb[13].mxu1 }
 0x1e2   : > { %v7593_v21 = vpop.f32.mrb[14].mxu1 }
 0x1e3   : > { %v7595_v23 = vpop.f32.mrb[15].mxu1 }
 0x1e8   : > { %v7597_v24 = vpop.f32.mrb[16].mxu1 }
 0x1e9   : > { %v7599_v25 = vpop.f32.mrb[17].mxu1 }
 0x1ea   : > { %v7601_v26 = vpop.f32.mrb[18].mxu1 }
 0x1eb   : > { %v7603_v27 = vpop.f32.mrb[19].mxu1 }
 0x1f8   : > { %v6306_v28 = vpop.f32.mrb[0].mxu0 }
 0x1f9   : > { %v6342_v30 = vadd.f32 %v6306_v28, %v6116_v36  ;;  %v4988_v31 = vpop.f32.mrb[1].mxu0 }
 0x1fa   : > { %v6343_v32 = vadd.f32 %v4988_v31, %v2163_v9  ;;  %v6307_v33 = vpop.f32.mrb[2].mxu0 }
 0x1fb   : > { %v5248_v34 = vadd.f32 %v6342_v30, %v7611_v29  ;;  %v6344_v35 = vadd.f32 %v6307_v33, %v6117_v10  ;;  %v4991_v37 = vpop.f32.mrb[3].mxu0 }
 0x1fc   : > { %v5246_v39 = vadd.f32 %v6343_v32, %v7611_v29  ;;  %v6345_v7 = vadd.f32 %v4991_v37, %v2166_v11 }
 0x1fd   : > { %v5284_v57 = vmax.f32 %v5248_v34, 0.0  ;;  %v5249_v41 = vadd.f32 %v6344_v35, %v7611_v29 }
 0x1fe   : > { %v5282_v42 = vmax.f32 %v5246_v39, 0.0  ;;  %v5247_v43 = vadd.f32 %v6345_v7, %v7611_v29 }
 0x1ff   : > { %5320 = vst [vmem:[%s7617_s11 + $0x10] sm:$0xff] %v5284_v57  ;;  %v5285_v44 = vmax.f32 %v5249_v41, 0.0 }
 0x200   : > { %5318 = vst [vmem:[%s7617_s11] sm:$0xff] %v5282_v42  ;;  %v5283_v45 = vmax.f32 %v5247_v43, 0.0  ;;  %v6310_v46 = vpop.f32.mrb[4].mxu0 }
 0x201   : > { %5321 = vst [vmem:[%s7617_s11 + $0x18] sm:$0xff] %v5285_v44  ;;  %v6346_v47 = vadd.f32 %v6310_v46, %v6120_v12  ;;  %v5004_v48 = vpop.f32.mrb[5].mxu0 }
 0x202   : > { %5319 = vst [vmem:[%s7617_s11 + $0x8] sm:$0xff] %v5283_v45  ;;  %v6347_v49 = vadd.f32 %v5004_v48, %v2179_v13  ;;  %v6311_v50 = vpop.f32.mrb[6].mxu0 }
 0x203   : > { %v5252_v51 = vadd.f32 %v6346_v47, %v7611_v29  ;;  %v6348_v52 = vadd.f32 %v6311_v50, %v6121_v14  ;;  %v5007_v53 = vpop.f32.mrb[7].mxu0 }
 0x204   : > { %v5250_v54 = vadd.f32 %v6347_v49, %v7611_v29  ;;  %v6349_v55 = vadd.f32 %v5007_v53, %v2182_v15 }
 0x205   : > { %v5288_v56 = vmax.f32 %v5252_v51, 0.0  ;;  %v5253_v58 = vadd.f32 %v6348_v52, %v7611_v29 }
 0x206   : > { %v5286_v59 = vmax.f32 %v5250_v54, 0.0  ;;  %v5251_v40 = vadd.f32 %v6349_v55, %v7611_v29 }
 0x207   : > { %5324 = vst [vmem:[%s7617_s11 + $0x30] sm:$0xff] %v5288_v56  ;;  %v5289_v60 = vmax.f32 %v5253_v58, 0.0 }
 0x208   : > { %5322 = vst [vmem:[%s7617_s11 + $0x20] sm:$0xff] %v5286_v59  ;;  %v5287_v61 = vmax.f32 %v5251_v40, 0.0  ;;  %v6314_v62 = vpop.f32.mrb[8].mxu0 }
 0x209   : > { %5325 = vst [vmem:[%s7617_s11 + $0x38] sm:$0xff] %v5289_v60  ;;  %v6350_v63 = vadd.f32 %v6314_v62, %v6124_v16  ;;  %v5020_v3 = vpop.f32.mrb[9].mxu0 }
 0x20a   : > { %5323 = vst [vmem:[%s7617_s11 + $0x28] sm:$0xff] %v5287_v61  ;;  %v6351_v0 = vadd.f32 %v5020_v3, %v2195_v22  ;;  %v6315_v38 = vpop.f32.mrb[10].mxu0 }
 0x20b   : > { %v5256_v1 = vadd.f32 %v6350_v63, %v7611_v29  ;;  %v6352_v2 = vadd.f32 %v6315_v38, %v6125_v17  ;;  %v5023_v4 = vpop.f32.mrb[11].mxu0 }
 0x20c   : > { %v5254_v5 = vadd.f32 %v6351_v0, %v7611_v29  ;;  %v6353_v6 = vadd.f32 %v5023_v4, %v2198_v18 }
 0x20d   : > { %v5292_v36 = vmax.f32 %v5256_v1, 0.0  ;;  %v5257_v9 = vadd.f32 %v6352_v2, %v7611_v29 }
 0x20e   : > { %v5290_v11 = vmax.f32 %v5254_v5, 0.0  ;;  %v5255_v12 = vadd.f32 %v6353_v6, %v7611_v29 }
 0x20f   : > { %5328 = vst [vmem:[%s7617_s11 + $0x50] sm:$0xff] %v5292_v36  ;;  %v5293_v14 = vmax.f32 %v5257_v9, 0.0 }
 0x210   : > { %v6174_v8 = vpop.f32.mrb[20].mxu1  ;;  %5326 = vst [vmem:[%s7617_s11 + $0x40] sm:$0xff] %v5290_v11  ;;  %v5291_v16 = vmax.f32 %v5255_v12, 0.0  ;;  %v6318_v22 = vpop.f32.mrb[12].mxu0 }
 0x211   : > { %v2888_v10 = vpop.f32.mrb[21].mxu1  ;;  %5329 = vst [vmem:[%s7617_s11 + $0x58] sm:$0xff] %v5293_v14  ;;  %v6354_v17 = vadd.f32 %v6318_v22, %v7589_v19  ;;  %v5036_v18 = vpop.f32.mrb[13].mxu0 }
 0x212   : > { %v6175_v13 = vpop.f32.mrb[22].mxu1  ;;  %5327 = vst [vmem:[%s7617_s11 + $0x48] sm:$0xff] %v5291_v16  ;;  %v6355_v28 = vadd.f32 %v5036_v18, %v7591_v20  ;;  %v6319_v30 = vpop.f32.mrb[14].mxu0 }
 0x213   : > { %v2891_v15 = vpop.f32.mrb[23].mxu1  ;;  %v5260_v31 = vadd.f32 %v6354_v17, %v7611_v29  ;;  %v6356_v32 = vadd.f32 %v6319_v30, %v7593_v21  ;;  %v5039_v33 = vpop.f32.mrb[15].mxu0 }
 0x214   : > { %v5258_v34 = vadd.f32 %v6355_v28, %v7611_v29  ;;  %v6357_v35 = vadd.f32 %v5039_v33, %v7595_v23 }
 0x215   : > { %v5296_v19 = vmax.f32 %v5260_v31, 0.0  ;;  %v5261_v39 = vadd.f32 %v6356_v32, %v7611_v29 }
 0x216   : > { %v5294_v57 = vmax.f32 %v5258_v34, 0.0  ;;  %v5259_v20 = vadd.f32 %v6357_v35, %v7611_v29 }
 0x217   : > { %5332 = vst [vmem:[%s7617_s11 + $0x70] sm:$0xff] %v5296_v19  ;;  %v5297_v42 = vmax.f32 %v5261_v39, 0.0 }
 0x218   : > { %v6178_v37 = vpop.f32.mrb[24].mxu1  ;;  %5330 = vst [vmem:[%s7617_s11 + $0x60] sm:$0xff] %v5294_v57  ;;  %v5295_v21 = vmax.f32 %v5259_v20, 0.0  ;;  %v6322_v44 = vpop.f32.mrb[16].mxu0 }
 0x219   : > { %v2904_v7 = vpop.f32.mrb[25].mxu1  ;;  %5333 = vst [vmem:[%s7617_s11 + $0x78] sm:$0xff] %v5297_v42  ;;  %v6358_v45 = vadd.f32 %v6322_v44, %v7597_v24  ;;  %v5052_v23 = vpop.f32.mrb[17].mxu0 }
 0x21a   : > { %v6179_v41 = vpop.f32.mrb[26].mxu1  ;;  %5331 = vst [vmem:[%s7617_s11 + $0x68] sm:$0xff] %v5295_v21  ;;  %v6359_v46 = vadd.f32 %v5052_v23, %v7599_v25  ;;  %v6323_v47 = vpop.f32.mrb[18].mxu0 }
 0x21b   : > { %v2907_v43 = vpop.f32.mrb[27].mxu1  ;;  %v5264_v48 = vadd.f32 %v6358_v45, %v7611_v29  ;;  %v6360_v49 = vadd.f32 %v6323_v47, %v7601_v26  ;;  %v5055_v50 = vpop.f32.mrb[19].mxu0 }
 0x21c   : > { %v5262_v51 = vadd.f32 %v6359_v46, %v7611_v29  ;;  %v6361_v52 = vadd.f32 %v5055_v50, %v7603_v27 }
 0x21d   : > { %v5300_v24 = vmax.f32 %v5264_v48, 0.0  ;;  %v5265_v54 = vadd.f32 %v6360_v49, %v7611_v29 }
 0x21e   : > { %v5298_v56 = vmax.f32 %v5262_v51, 0.0  ;;  %v5263_v25 = vadd.f32 %v6361_v52, %v7611_v29 }
 0x21f   : > { %5336 = vst [vmem:[%s7617_s11 + $0x90] sm:$0xff] %v5300_v24  ;;  %v5301_v59 = vmax.f32 %v5265_v54, 0.0 }
 0x220   : > { %v6182_v53 = vpop.f32.mrb[28].mxu1  ;;  %5334 = vst [vmem:[%s7617_s11 + $0x80] sm:$0xff] %v5298_v56  ;;  %v5299_v26 = vmax.f32 %v5263_v25, 0.0  ;;  %v6326_v60 = vpop.f32.mrb[20].mxu0 }
 0x221   : > { %v2920_v55 = vpop.f32.mrb[29].mxu1  ;;  %5337 = vst [vmem:[%s7617_s11 + $0x98] sm:$0xff] %v5301_v59  ;;  %v6362_v61 = vadd.f32 %v6326_v60, %v6174_v8  ;;  %v5068_v62 = vpop.f32.mrb[21].mxu0 }
 0x222   : > { %v6183_v58 = vpop.f32.mrb[30].mxu1  ;;  %5335 = vst [vmem:[%s7617_s11 + $0x88] sm:$0xff] %v5299_v26  ;;  %v6363_v27 = vadd.f32 %v5068_v62, %v2888_v10  ;;  %v6327_v63 = vpop.f32.mrb[22].mxu0 }
 0x223   : > { %v2923_v40 = vpop.f32.mrb[31].mxu1  ;;  %v5268_v3 = vadd.f32 %v6362_v61, %v7611_v29  ;;  %v6364_v0 = vadd.f32 %v6327_v63, %v6175_v13  ;;  %v5071_v38 = vpop.f32.mrb[23].mxu0 }
 0x224   : > { %v5266_v1 = vadd.f32 %v6363_v27, %v7611_v29  ;;  %v6365_v2 = vadd.f32 %v5071_v38, %v2891_v15 }
 0x225   : > { %v5304_v5 = vmax.f32 %v5268_v3, 0.0  ;;  %v5269_v6 = vadd.f32 %v6364_v0, %v7611_v29 }
 0x226   : > { %v5302_v36 = vmax.f32 %v5266_v1, 0.0  ;;  %v5267_v9 = vadd.f32 %v6365_v2, %v7611_v29 }
 0x227   : > { %5340 = vst [vmem:[%s7617_s11 + $0xb0] sm:$0xff] %v5304_v5  ;;  %v5305_v11 = vmax.f32 %v5269_v6, 0.0 }
 0x228   : > { %v6186_v4 = vpop.f32.mrb[32].mxu1  ;;  %5338 = vst [vmem:[%s7617_s11 + $0xa0] sm:$0xff] %v5302_v36  ;;  %v5303_v13 = vmax.f32 %v5267_v9, 0.0  ;;  %v6330_v14 = vpop.f32.mrb[24].mxu0 }
 0x229   : > { %v2936_v8 = vpop.f32.mrb[33].mxu1  ;;  %5341 = vst [vmem:[%s7617_s11 + $0xb8] sm:$0xff] %v5305_v11  ;;  %v6366_v16 = vadd.f32 %v6330_v14, %v6178_v37  ;;  %v5084_v15 = vpop.f32.mrb[25].mxu0 }
 0x22a   : > { %v6187_v10 = vpop.f32.mrb[34].mxu1  ;;  %5339 = vst [vmem:[%s7617_s11 + $0xa8] sm:$0xff] %v5303_v13  ;;  %v6367_v22 = vadd.f32 %v5084_v15, %v2904_v7  ;;  %v6331_v17 = vpop.f32.mrb[26].mxu0 }
 0x22b   : > { %v2939_v12 = vpop.f32.mrb[35].mxu1  ;;  %v5272_v18 = vadd.f32 %v6366_v16, %v7611_v29  ;;  %v6368_v28 = vadd.f32 %v6331_v17, %v6179_v41  ;;  %v5087_v30 = vpop.f32.mrb[27].mxu0 }
 0x22c   : > { %v5270_v31 = vadd.f32 %v6367_v22, %v7611_v29  ;;  %v6369_v32 = vadd.f32 %v5087_v30, %v2907_v43 }
 0x22d   : > { %v5308_v33 = vmax.f32 %v5272_v18, 0.0  ;;  %v5273_v34 = vadd.f32 %v6368_v28, %v7611_v29 }
 0x22e   : > { %v5306_v35 = vmax.f32 %v5270_v31, 0.0  ;;  %v5271_v37 = vadd.f32 %v6369_v32, %v7611_v29 }
 0x22f   : > { %5344 = vst [vmem:[%s7617_s11 + $0xd0] sm:$0xff] %v5308_v33  ;;  %v5309_v19 = vmax.f32 %v5273_v34, 0.0 }
 0x230   : > { %5342 = vst [vmem:[%s7617_s11 + $0xc0] sm:$0xff] %v5306_v35  ;;  %v5307_v39 = vmax.f32 %v5271_v37, 0.0  ;;  %v6334_v7 = vpop.f32.mrb[28].mxu0 }
 0x231   : > { %5345 = vst [vmem:[%s7617_s11 + $0xd8] sm:$0xff] %v5309_v19  ;;  %v6370_v57 = vadd.f32 %v6334_v7, %v6182_v53  ;;  %v5100_v20 = vpop.f32.mrb[29].mxu0 }
 0x232   : > { %5343 = vst [vmem:[%s7617_s11 + $0xc8] sm:$0xff] %v5307_v39  ;;  %v6371_v41 = vadd.f32 %v5100_v20, %v2920_v55  ;;  %v6335_v42 = vpop.f32.mrb[30].mxu0 }
 0x233   : > { %v5276_v43 = vadd.f32 %v6370_v57, %v7611_v29  ;;  %v6372_v21 = vadd.f32 %v6335_v42, %v6183_v58  ;;  %v5103_v44 = vpop.f32.mrb[31].mxu0 }
 0x234   : > { %v5274_v45 = vadd.f32 %v6371_v41, %v7611_v29  ;;  %v6373_v23 = vadd.f32 %v5103_v44, %v2923_v40 }
 0x235   : > { %v5312_v46 = vmax.f32 %v5276_v43, 0.0  ;;  %v5277_v47 = vadd.f32 %v6372_v21, %v7611_v29 }
 0x236   : > { %v5310_v48 = vmax.f32 %v5274_v45, 0.0  ;;  %v5275_v49 = vadd.f32 %v6373_v23, %v7611_v29 }
 0x237   : > { %5348 = vst [vmem:[%s7617_s11 + $0xf0] sm:$0xff] %v5312_v46  ;;  %v5313_v50 = vmax.f32 %v5277_v47, 0.0 }
 0x238   : > { %5346 = vst [vmem:[%s7617_s11 + $0xe0] sm:$0xff] %v5310_v48  ;;  %v5311_v51 = vmax.f32 %v5275_v49, 0.0  ;;  %v6338_v52 = vpop.f32.mrb[32].mxu0 }
 0x239   : > { %5349 = vst [vmem:[%s7617_s11 + $0xf8] sm:$0xff] %v5313_v50  ;;  %v6374_v53 = vadd.f32 %v6338_v52, %v6186_v4  ;;  %v5116_v24 = vpop.f32.mrb[33].mxu0 }
 0x23a   : > { %5347 = vst [vmem:[%s7617_s11 + $0xe8] sm:$0xff] %v5311_v51  ;;  %v6375_v54 = vadd.f32 %v5116_v24, %v2936_v8  ;;  %v6339_v55 = vpop.f32.mrb[34].mxu0 }
 0x23b   : > { %v5280_v56 = vadd.f32 %v6374_v53, %v7611_v29  ;;  %v6376_v25 = vadd.f32 %v6339_v55, %v6187_v10  ;;  %v5119_v58 = vpop.f32.mrb[35].mxu0 }
 0x23c   : > { %v5278_v59 = vadd.f32 %v6375_v54, %v7611_v29  ;;  %v6377_v40 = vadd.f32 %v5119_v58, %v2939_v12 }
 0x23d   : > { %v5316_v26 = vmax.f32 %v5280_v56, 0.0  ;;  %v5281_v60 = vadd.f32 %v6376_v25, %v7611_v29 }
 0x23e   : > { %v5314_v61 = vmax.f32 %v5278_v59, 0.0  ;;  %v5279_v62 = vadd.f32 %v6377_v40, %v7611_v29 }
 0x23f   : > { %5352 = vst [vmem:[%s7617_s11 + $0x110] sm:$0xff] %v5316_v26  ;;  %v5317_v27 = vmax.f32 %v5281_v60, 0.0 }
 0x240   : > { %5350 = vst [vmem:[%s7617_s11 + $0x100] sm:$0xff] %v5314_v61  ;;  %v5315_v63 = vmax.f32 %v5279_v62, 0.0 }
 0x241   : > { %5353 = vst [vmem:[%s7617_s11 + $0x118] sm:$0xff] %v5317_v27 }
 0x242   : > { %5351 = vst [vmem:[%s7617_s11 + $0x108] sm:$0xff] %v5315_v63 }
 0x243   : > { %6884 = shalt.err (!%p6881_p5)
}
 0x244   : > { %s6885_s4 = scalar_lea.hbm %s7697_s26, 4608  ;;  %s6889_s7 = scalar_lea.hbm %s7755_s3, 9216 }
 0x245   : > { %p6886_p6 = scmp.ne.s32.totalorder %s7697_s26, %s6885_s4  ;;  %p6890_p10 = scmp.lt.u32.totalorder %s7697_s26, %s7755_s3 }
 0x246   : > { %p6891_p11 = scmp.lt.u32.totalorder %s6889_s7, %s6885_s4  ;;  %p6893_p13 = scmp.lt.u32.totalorder %s6885_s4, %s7697_s26 }
 0x247   : > { %p6887_p7 = pnand %p6886_p6, %p7014_p4 }
 0x248   : > { %p6892_p12 = por %p6891_p11, %p6890_p10 }
 0x249   : > { %p6888_p9 = pneg %p6887_p7 }
 0x24a   : > { %p6894_p0 = por %p6893_p13, %p6892_p12 }
 0x24c   : > { %p6895_p1 = pnand %p6894_p0, %p6888_p9 }
 0x24e   : > { %6898 = shalt.err (!%p6895_p1)
}
 0x24f   : > { %s6952_s10 = smov 128   ;;  %s6953_s11 = smov 8  }
 0x250   : > { %6643 = dma.vmem_to_hbm [thread:$0]  (%p7014_p4), %s7699_s19, 4608, %s7697_s26, %s7706_s15, %s6952_s10, %s6952_s10, %s6953_s11  }
 0x251 PF: > { %p6649_p2 = scmp.ge.s32.totalorder %s6949_s17, 2  ;;  %s5386_s18 = sand.u32 1, %s6929_s12  }
 0x252   : > { %s5387_s21 = scalar_lea.sflag [#allocation4], %s5386_s18 }
 0x253   : > { %p6646_p3 = pnand %p6649_p2, %p7021_p8 }
 0x255   : > { %6924 = dma.done.wait (!%p6646_p3), %s5387_s21, 4608  }
 0x256   : > { %6926 = vsyncadd (!%p6646_p3), %s5387_s21, 4294962688  ;;  %s16_s17 = sadd.s32 1, %s6949_s17   ;;  %s7758_s12 = smov %s6933_s13 }
 0x257   : > { %p13_p5 = scmp.ge.s32.totalorder %s16_s17, 4   ;;  %s7759_s13 = smov %s6937_s14 }
 0x258   : > { %s7760_s14 = smov %s7027_s25  ;;  %s7761_s15 = smov %s6945_s16 }
 0x259   : > { %s7762_s16 = smov %s7764_s20  ;;  %15 = sbr.rel (!%p13_p5) target bundleno = 4 (0x4), region = 81 }
 0x260   :  { %5392 = vsyncpa [#allocation4], 1 }
 0x261   :  { %5394 = vsyncpa [#allocation4 + $0x1], 1 }

</bundles_post_ra>
